<compile_context>
chip_gen: v7x
topology: tpu7x:2x2x1
jax: 0.10.0
libtpu: 0.0.40
codegen_flags: <defaults>
</compile_context>

<pallas_src>
import jax
import jax.numpy as jnp
from jax.experimental import pallas as pl
from jax.experimental.pallas import tpu as pltpu

H = W = 8
C_IN, C1, C2, C3 = 192, 64, 32, 3
C3_PAD = 8                      # pad layer-3 Cout 3 -> 8 (sublane granule)

# tap order t = kh*3 + kw ; source-pixel offset for ConvTranspose2d(k=3,s=1,p=1):
#   y[i, j] += W[:, :, kh, kw] * x[i + (1-kh), j + (1-kw)]
TAP_OFFSETS = tuple((1 - kh, 1 - kw) for kh in range(3) for kw in range(3))


# --------------------------- fused Pallas kernel ---------------------------
def _make_decoder_kernel(l):
    """Build the kernel for one lane-packed block of `l = nb*H*W` pixels."""

    def kernel(x1_ref, s_ref, w1_ref, w2_ref, w3_ref,
               b1_ref, b2_ref, b3_ref, o_ref):
        # ---- layer 1: precomputed im2col input, one big-K bf16 MXU matmul ----
        h1 = jnp.dot(w1_ref[...], x1_ref[...],
                     preferred_element_type=jnp.float32)            # (64, l) f32
        h1 = jnp.maximum(h1 + b1_ref[...], 0.0)

        def im2col(h):
            # (C, l) f32 -> (9C, l) bf16.  One bf16 matmul against the 0/1
            # shift-and-stack matrix (exact selection), then lane-aligned
            # slices re-stacked along channels (sublanes).
            z = jnp.dot(h.astype(jnp.bfloat16), s_ref[...],
                        preferred_element_type=jnp.float32)         # (C, 9l)
            zb = z.astype(jnp.bfloat16)                              # exact
            return jnp.concatenate(
                [zb[:, t * l:(t + 1) * l] for t in range(9)], axis=0)

        # ---- layer 2 ----
        h2 = jnp.dot(w2_ref[...], im2col(h1),
                     preferred_element_type=jnp.float32)            # (32, l)
        h2 = jnp.maximum(h2 + b2_ref[...], 0.0)

        # ---- layer 3 (Cout padded to 8) ----
        h3 = jnp.dot(w3_ref[...], im2col(h2),
                     preferred_element_type=jnp.float32)            # (8, l)
        o_ref[...] = h3 + b3_ref[...]

    return kernel


# ------------------------------ wrapper prep --------------------------------
def _cat_weight(wt, cout_pad=None):
    """PyTorch ConvTranspose2d weight (Cin, Cout, 3, 3) -> (Cout[_pad], 9*Cin) bf16."""
    cin, cout = wt.shape[0], wt.shape[1]
    w = jnp.transpose(wt, (1, 2, 3, 0)).reshape(cout, 9 * cin)
    if cout_pad is not None and cout_pad > cout:
        w = jnp.pad(w, ((0, cout_pad - cout), (0, 0)))
    return w.astype(jnp.bfloat16)


def _shift_stack_matrix(h, w, nb):
    """(L, 9L) 0/1 matrix, L = nb*h*w.  Column block t maps x -> x shifted by
    tap t's source offset with zero boundary padding (per image segment)."""
    hw = h * w
    L = nb * hw
    g = jnp.arange(L)
    m, p = g // hw, g % hw
    i, j = p // w, p % w
    gp = jnp.arange(L)[:, None]
    cols = []
    for dh, dw in TAP_OFFSETS:
        si, sj = i + dh, j + dw
        valid = (si >= 0) & (si < h) & (sj >= 0) & (sj < w)
        src = m * hw + si * w + sj
        cols.append(jnp.where(valid[None, :] & (gp == src[None, :]), 1.0, 0.0))
    return jnp.concatenate(cols, axis=1).astype(jnp.bfloat16)   # 0/1 exact in bf16


def _im2col_nchw(x):
    """(N, C, H, W) f32 -> (9*C, N*H*W): 9 shifted, zero-padded copies stacked
    along channels; columns are image-major, pixel-minor."""
    n, c, h, w = x.shape
    xpad = jnp.pad(x, ((0, 0), (0, 0), (1, 1), (1, 1)))
    taps = [xpad[:, :, 1 + dh:1 + dh + h, 1 + dw:1 + dw + w]
            for dh, dw in TAP_OFFSETS]
    stk = jnp.stack(taps, axis=0)                         # (9, N, C, H, W)
    return jnp.transpose(stk, (0, 2, 1, 3, 4)).reshape(9 * c, n * h * w)


def _images_per_block(n, hw):
    """Lane-pack as many images as possible per grid step (>=128 lanes), with a
    cap so very large batches still tile across a 'parallel' grid axis."""
    cap = max(1, 4096 // hw)
    best = 1
    for d in range(1, n + 1):
        if n % d == 0 and d <= cap and (d == n or (d * hw) % 128 == 0):
            best = d
    return best


@jax.jit
def decoder_forward(x_nchw, params):
    n, cin, h, w = x_nchw.shape
    hw = h * w
    nb = _images_per_block(n, hw)          # images per grid step
    g = n // nb
    l = nb * hw                            # lanes per block (128 for batch=2)

    # Layer-1 im2col precomputed under jit (cheap XLA pads/slices, no dots).
    x1 = _im2col_nchw(x_nchw.astype(jnp.float32)).astype(jnp.bfloat16)  # (1728, n*hw)
    s_cat = _shift_stack_matrix(h, w, nb)                               # (l, 9l)

    w1 = _cat_weight(params["w1"])                     # (64, 1728) bf16
    w2 = _cat_weight(params["w2"])                     # (32, 576)  bf16
    w3 = _cat_weight(params["w3"], cout_pad=C3_PAD)    # (8, 288)   bf16
    b1 = params["b1"].astype(jnp.float32)[:, None]
    b2 = params["b2"].astype(jnp.float32)[:, None]
    b3 = jnp.pad(params["b3"].astype(jnp.float32), (0, C3_PAD - C3))[:, None]

    c1, c2 = w1.shape[0], w2.shape[0]
    flops = int(2 * n * hw * (9 * (cin * c1 + c1 * c2 + c2 * C3_PAD)
                              + 9 * l * (c1 + c2)))
    bytes_accessed = int(2 * (x1.size + s_cat.size + w1.size + w2.size + w3.size)
                         + 4 * (b1.size + b2.size + b3.size)
                         + 4 * C3_PAD * n * hw)
    cost = pl.CostEstimate(flops=flops, transcendentals=0,
                           bytes_accessed=bytes_accessed)

    out = pl.pallas_call(
        _make_decoder_kernel(l),
        out_shape=jax.ShapeDtypeStruct((C3_PAD, n * hw), jnp.float32),
        grid=(g,),
        in_specs=[
            pl.BlockSpec((9 * cin, l), lambda i: (0, i)),   # layer-1 im2col block
            pl.BlockSpec(s_cat.shape, lambda i: (0, 0)),
            pl.BlockSpec(w1.shape, lambda i: (0, 0)),
            pl.BlockSpec(w2.shape, lambda i: (0, 0)),
            pl.BlockSpec(w3.shape, lambda i: (0, 0)),
            pl.BlockSpec(b1.shape, lambda i: (0, 0)),
            pl.BlockSpec(b2.shape, lambda i: (0, 0)),
            pl.BlockSpec(b3.shape, lambda i: (0, 0)),
        ],
        out_specs=pl.BlockSpec((C3_PAD, l), lambda i: (0, i)),
        compiler_params=pltpu.CompilerParams(
            dimension_semantics=("parallel",)),
        cost_estimate=cost,
    )(x1, s_cat, w1, w2, w3, b1, b2, b3)

    # (8, N*HW) image-major columns -> NCHW, drop padded channels.
    return out.reshape(C3_PAD, n, h, w)[:C3].transpose(1, 0, 2, 3)


# ----------------------------- parameters -----------------------------------
def init_params(key):
    dims = [(C_IN, C1), (C1, C2), (C2, C3)]
    params = {}
    for i, (cin, cout) in enumerate(dims, start=1):
        key, kw_, kb = jax.random.split(key, 3)
        bound = 1.0 / jnp.sqrt(cin * 3.0 * 3.0)
        params[f"w{i}"] = jax.random.uniform(
            kw_, (cin, cout, 3, 3), jnp.float32, -bound, bound)
        params[f"b{i}"] = jax.random.uniform(
            kb, (cout,), jnp.float32, -bound, bound)
    return params


# ------------------------- pure-JAX references -------------------------------
# NOTE: all reference dots are f32 (bf16 rounding emulated by a cast round-trip)
# so the check runs on any backend, incl. the CPU DotThunk.
def _ref_conv_transpose(x_nchw, wt, b, relu, round_bf16):
    x = x_nchw.astype(jnp.float32)
    wt = wt.astype(jnp.float32)
    if round_bf16:
        x = x.astype(jnp.bfloat16).astype(jnp.float32)
        wt = wt.astype(jnp.bfloat16).astype(jnp.float32)
    n, cin, h, w = x.shape
    cout = wt.shape[1]
    xpad = jnp.pad(x, ((0, 0), (0, 0), (1, 1), (1, 1)))
    y = jnp.broadcast_to(b[None, :, None, None], (n, cout, h, w)).astype(jnp.float32)
    for kh in range(3):
        for kw in range(3):
            sl = xpad[:, :, 2 - kh:2 - kh + h, 2 - kw:2 - kw + w]
            y = y + jnp.einsum("ncij,cd->ndij", sl, wt[:, :, kh, kw])
    return jnp.maximum(y, 0.0) if relu else y


def _ref_decoder(x_nchw, params, round_bf16):
    x = _ref_conv_transpose(x_nchw, params["w1"], params["b1"], True, round_bf16)
    x = _ref_conv_transpose(x, params["w2"], params["b2"], True, round_bf16)
    x = _ref_conv_transpose(x, params["w3"], params["b3"], False, round_bf16)
    return x


# --------------------------------- main --------------------------------------
if __name__ == "__main__":
    key = jax.random.PRNGKey(0)
    kp, kx = jax.random.split(key)
    params = init_params(kp)

    # batch=2, 192 input channels (fixed by the module), 8x8 spatial
    x = jax.random.normal(kx, (2, C_IN, H, W), jnp.float32)

    out = jax.block_until_ready(decoder_forward(x, params))
    assert out.shape == (2, C3, H, W), out.shape

    # tight check vs a reference matching the kernel numerics
    # (bf16-rounded operands, f32 accumulation / bias / ReLU)
    ref_bf16 = _ref_decoder(x, params, round_bf16=True)
    err_bf16 = float(jnp.max(jnp.abs(out - ref_bf16)))
    assert err_bf16 < 5e-3, f"bf16-matched reference mismatch: {err_bf16}"

    # loose sanity check vs the full-f32 reference
    ref_f32 = _ref_decoder(x, params, round_bf16=False)
    err_f32 = float(jnp.max(jnp.abs(out - ref_f32)))
    assert err_f32 < 5e-2, f"f32 reference mismatch: {err_f32}"

    print("KERNEL_OK")
</pallas_src>

<mosaic_0001>
module attributes {stable_mosaic.version = 11 : i64} {
  func.func @kernel(%arg0: i32, %arg1: memref<1728x128xbf16, #tpu.memory_space<vmem>>, %arg2: memref<128x1152xbf16, #tpu.memory_space<vmem>>, %arg3: memref<64x1728xbf16, #tpu.memory_space<vmem>>, %arg4: memref<32x576xbf16, #tpu.memory_space<vmem>>, %arg5: memref<8x288xbf16, #tpu.memory_space<vmem>>, %arg6: memref<64x1xf32, #tpu.memory_space<vmem>>, %arg7: memref<32x1xf32, #tpu.memory_space<vmem>>, %arg8: memref<8x1xf32, #tpu.memory_space<vmem>>, %arg9: memref<8x128xf32, #tpu.memory_space<vmem>>) attributes {dimension_semantics = [#tpu.dimension_semantics<parallel>], iteration_bounds = array<i64: 1>, scalar_prefetch = 0 : i64, scratch_operands = 0 : i64, tpu.core_type = #tpu.core_type<tc>, window_params = [{transform_indices = @transform_0, window_bounds = array<i64: 1728, 128>}, {pipeline_mode = #tpu.pipeline_mode<synchronous>, transform_indices = @transform_1, window_bounds = array<i64: 128, 1152>}, {pipeline_mode = #tpu.pipeline_mode<synchronous>, transform_indices = @transform_2, window_bounds = array<i64: 64, 1728>}, {pipeline_mode = #tpu.pipeline_mode<synchronous>, transform_indices = @transform_3, window_bounds = array<i64: 32, 576>}, {pipeline_mode = #tpu.pipeline_mode<synchronous>, transform_indices = @transform_4, window_bounds = array<i64: 8, 288>}, {pipeline_mode = #tpu.pipeline_mode<synchronous>, transform_indices = @transform_5, window_bounds = array<i64: 64, 1>}, {pipeline_mode = #tpu.pipeline_mode<synchronous>, transform_indices = @transform_6, window_bounds = array<i64: 32, 1>}, {pipeline_mode = #tpu.pipeline_mode<synchronous>, transform_indices = @transform_7, window_bounds = array<i64: 8, 1>}, {transform_indices = @transform_8, window_bounds = array<i64: 8, 128>}]} {
    %c0 = arith.constant 0 : index
    %c0_0 = arith.constant 0 : index
    %0 = vector.load %arg3[%c0, %c0_0] : memref<64x1728xbf16, #tpu.memory_space<vmem>>, vector<64x1728xbf16>
    %c0_1 = arith.constant 0 : index
    %c0_2 = arith.constant 0 : index
    %1 = vector.load %arg1[%c0_1, %c0_2] : memref<1728x128xbf16, #tpu.memory_space<vmem>>, vector<1728x128xbf16>
    %cst = arith.constant dense<0.000000e+00> : vector<64x128xf32>
    %2 = tpu.matmul %0, %1, %cst {dimension_numbers = #tpu.dot_dimension_numbers<[1], [0], [0], [1], [0, 0, 1, 1], [], []>} : vector<64x1728xbf16>, vector<1728x128xbf16>, vector<64x128xf32> -> vector<64x128xf32>
    %c0_3 = arith.constant 0 : index
    %c0_4 = arith.constant 0 : index
    %3 = vector.load %arg6[%c0_3, %c0_4] : memref<64x1xf32, #tpu.memory_space<vmem>>, vector<64x1xf32>
    %4 = vector.broadcast %3 : vector<64x1xf32> to vector<64x128xf32>
    %5 = arith.addf %2, %4 : vector<64x128xf32>
    %cst_5 = arith.constant 0.000000e+00 : f32
    %6 = vector.broadcast %cst_5 : f32 to vector<64x128xf32>
    %7 = arith.maximumf %5, %6 : vector<64x128xf32>
    %c0_6 = arith.constant 0 : index
    %c0_7 = arith.constant 0 : index
    %8 = vector.load %arg4[%c0_6, %c0_7] : memref<32x576xbf16, #tpu.memory_space<vmem>>, vector<32x576xbf16>
    %9 = arith.truncf %7 : vector<64x128xf32> to vector<64x128xbf16>
    %c0_8 = arith.constant 0 : index
    %c0_9 = arith.constant 0 : index
    %10 = vector.load %arg2[%c0_8, %c0_9] : memref<128x1152xbf16, #tpu.memory_space<vmem>>, vector<128x1152xbf16>
    %cst_10 = arith.constant dense<0.000000e+00> : vector<64x1152xf32>
    %11 = tpu.matmul %9, %10, %cst_10 {dimension_numbers = #tpu.dot_dimension_numbers<[1], [0], [0], [1], [0, 0, 1, 1], [], []>} : vector<64x128xbf16>, vector<128x1152xbf16>, vector<64x1152xf32> -> vector<64x1152xf32>
    %12 = arith.truncf %11 : vector<64x1152xf32> to vector<64x1152xbf16>
    %13 = vector.extract_strided_slice %12 {offsets = [0, 0], sizes = [64, 128], strides = [1, 1]} : vector<64x1152xbf16> to vector<64x128xbf16>
    %14 = vector.extract_strided_slice %12 {offsets = [0, 128], sizes = [64, 128], strides = [1, 1]} : vector<64x1152xbf16> to vector<64x128xbf16>
    %15 = vector.extract_strided_slice %12 {offsets = [0, 256], sizes = [64, 128], strides = [1, 1]} : vector<64x1152xbf16> to vector<64x128xbf16>
    %16 = vector.extract_strided_slice %12 {offsets = [0, 384], sizes = [64, 128], strides = [1, 1]} : vector<64x1152xbf16> to vector<64x128xbf16>
    %17 = vector.extract_strided_slice %12 {offsets = [0, 512], sizes = [64, 128], strides = [1, 1]} : vector<64x1152xbf16> to vector<64x128xbf16>
    %18 = vector.extract_strided_slice %12 {offsets = [0, 640], sizes = [64, 128], strides = [1, 1]} : vector<64x1152xbf16> to vector<64x128xbf16>
    %19 = vector.extract_strided_slice %12 {offsets = [0, 768], sizes = [64, 128], strides = [1, 1]} : vector<64x1152xbf16> to vector<64x128xbf16>
    %20 = vector.extract_strided_slice %12 {offsets = [0, 896], sizes = [64, 128], strides = [1, 1]} : vector<64x1152xbf16> to vector<64x128xbf16>
    %21 = vector.extract_strided_slice %12 {offsets = [0, 1024], sizes = [64, 128], strides = [1, 1]} : vector<64x1152xbf16> to vector<64x128xbf16>
    %22 = tpu.concatenate %13, %14, %15, %16, %17, %18, %19, %20, %21 in 0 : vector<64x128xbf16>, vector<64x128xbf16>, vector<64x128xbf16>, vector<64x128xbf16>, vector<64x128xbf16>, vector<64x128xbf16>, vector<64x128xbf16>, vector<64x128xbf16>, vector<64x128xbf16> -> vector<576x128xbf16>
    %cst_11 = arith.constant dense<0.000000e+00> : vector<32x128xf32>
    %23 = tpu.matmul %8, %22, %cst_11 {dimension_numbers = #tpu.dot_dimension_numbers<[1], [0], [0], [1], [0, 0, 1, 1], [], []>} : vector<32x576xbf16>, vector<576x128xbf16>, vector<32x128xf32> -> vector<32x128xf32>
    %c0_12 = arith.constant 0 : index
    %c0_13 = arith.constant 0 : index
    %24 = vector.load %arg7[%c0_12, %c0_13] : memref<32x1xf32, #tpu.memory_space<vmem>>, vector<32x1xf32>
    %25 = vector.broadcast %24 : vector<32x1xf32> to vector<32x128xf32>
    %26 = arith.addf %23, %25 : vector<32x128xf32>
    %cst_14 = arith.constant 0.000000e+00 : f32
    %27 = vector.broadcast %cst_14 : f32 to vector<32x128xf32>
    %28 = arith.maximumf %26, %27 : vector<32x128xf32>
    %c0_15 = arith.constant 0 : index
    %c0_16 = arith.constant 0 : index
    %29 = vector.load %arg5[%c0_15, %c0_16] : memref<8x288xbf16, #tpu.memory_space<vmem>>, vector<8x288xbf16>
    %30 = arith.truncf %28 : vector<32x128xf32> to vector<32x128xbf16>
    %c0_17 = arith.constant 0 : index
    %c0_18 = arith.constant 0 : index
    %31 = vector.load %arg2[%c0_17, %c0_18] : memref<128x1152xbf16, #tpu.memory_space<vmem>>, vector<128x1152xbf16>
    %cst_19 = arith.constant dense<0.000000e+00> : vector<32x1152xf32>
    %32 = tpu.matmul %30, %31, %cst_19 {dimension_numbers = #tpu.dot_dimension_numbers<[1], [0], [0], [1], [0, 0, 1, 1], [], []>} : vector<32x128xbf16>, vector<128x1152xbf16>, vector<32x1152xf32> -> vector<32x1152xf32>
    %33 = arith.truncf %32 : vector<32x1152xf32> to vector<32x1152xbf16>
    %34 = vector.extract_strided_slice %33 {offsets = [0, 0], sizes = [32, 128], strides = [1, 1]} : vector<32x1152xbf16> to vector<32x128xbf16>
    %35 = vector.extract_strided_slice %33 {offsets = [0, 128], sizes = [32, 128], strides = [1, 1]} : vector<32x1152xbf16> to vector<32x128xbf16>
    %36 = vector.extract_strided_slice %33 {offsets = [0, 256], sizes = [32, 128], strides = [1, 1]} : vector<32x1152xbf16> to vector<32x128xbf16>
    %37 = vector.extract_strided_slice %33 {offsets = [0, 384], sizes = [32, 128], strides = [1, 1]} : vector<32x1152xbf16> to vector<32x128xbf16>
    %38 = vector.extract_strided_slice %33 {offsets = [0, 512], sizes = [32, 128], strides = [1, 1]} : vector<32x1152xbf16> to vector<32x128xbf16>
    %39 = vector.extract_strided_slice %33 {offsets = [0, 640], sizes = [32, 128], strides = [1, 1]} : vector<32x1152xbf16> to vector<32x128xbf16>
    %40 = vector.extract_strided_slice %33 {offsets = [0, 768], sizes = [32, 128], strides = [1, 1]} : vector<32x1152xbf16> to vector<32x128xbf16>
    %41 = vector.extract_strided_slice %33 {offsets = [0, 896], sizes = [32, 128], strides = [1, 1]} : vector<32x1152xbf16> to vector<32x128xbf16>
    %42 = vector.extract_strided_slice %33 {offsets = [0, 1024], sizes = [32, 128], strides = [1, 1]} : vector<32x1152xbf16> to vector<32x128xbf16>
    %43 = tpu.concatenate %34, %35, %36, %37, %38, %39, %40, %41, %42 in 0 : vector<32x128xbf16>, vector<32x128xbf16>, vector<32x128xbf16>, vector<32x128xbf16>, vector<32x128xbf16>, vector<32x128xbf16>, vector<32x128xbf16>, vector<32x128xbf16>, vector<32x128xbf16> -> vector<288x128xbf16>
    %cst_20 = arith.constant dense<0.000000e+00> : vector<8x128xf32>
    %44 = tpu.matmul %29, %43, %cst_20 {dimension_numbers = #tpu.dot_dimension_numbers<[1], [0], [0], [1], [0, 0, 1, 1], [], []>} : vector<8x288xbf16>, vector<288x128xbf16>, vector<8x128xf32> -> vector<8x128xf32>
    %c0_21 = arith.constant 0 : index
    %c0_22 = arith.constant 0 : index
    %45 = vector.load %arg8[%c0_21, %c0_22] : memref<8x1xf32, #tpu.memory_space<vmem>>, vector<8x1xf32>
    %46 = vector.broadcast %45 : vector<8x1xf32> to vector<8x128xf32>
    %47 = arith.addf %44, %46 : vector<8x128xf32>
    %c0_23 = arith.constant 0 : index
    %c0_24 = arith.constant 0 : index
    %48 = vector.load %arg9[%c0_23, %c0_24] : memref<8x128xf32, #tpu.memory_space<vmem>>, vector<8x128xf32>
    tpu.vector_store %arg9[%c0_23, %c0_24], %47 {strides = array<i32>} : memref<8x128xf32, #tpu.memory_space<vmem>>, vector<8x128xf32>,
    return
  }
  func.func @transform_0(%arg0: i32) -> (i32, i32) {
    %c0_i32 = arith.constant 0 : i32
    %c0_i32_0 = arith.constant 0 : i32
    return %c0_i32, %arg0 : i32, i32
  }
  func.func @transform_1(%arg0: i32) -> (i32, i32) {
    %c0_i32 = arith.constant 0 : i32
    %c0_i32_0 = arith.constant 0 : i32
    %c0_i32_1 = arith.constant 0 : i32
    return %c0_i32, %c0_i32_0 : i32, i32
  }
  func.func @transform_2(%arg0: i32) -> (i32, i32) {
    %c0_i32 = arith.constant 0 : i32
    %c0_i32_0 = arith.constant 0 : i32
    %c0_i32_1 = arith.constant 0 : i32
    return %c0_i32, %c0_i32_0 : i32, i32
  }
  func.func @transform_3(%arg0: i32) -> (i32, i32) {
    %c0_i32 = arith.constant 0 : i32
    %c0_i32_0 = arith.constant 0 : i32
    %c0_i32_1 = arith.constant 0 : i32
    return %c0_i32, %c0_i32_0 : i32, i32
  }
  func.func @transform_4(%arg0: i32) -> (i32, i32) {
    %c0_i32 = arith.constant 0 : i32
    %c0_i32_0 = arith.constant 0 : i32
    %c0_i32_1 = arith.constant 0 : i32
    return %c0_i32, %c0_i32_0 : i32, i32
  }
  func.func @transform_5(%arg0: i32) -> (i32, i32) {
    %c0_i32 = arith.constant 0 : i32
    %c0_i32_0 = arith.constant 0 : i32
    %c0_i32_1 = arith.constant 0 : i32
    return %c0_i32, %c0_i32_0 : i32, i32
  }
  func.func @transform_6(%arg0: i32) -> (i32, i32) {
    %c0_i32 = arith.constant 0 : i32
    %c0_i32_0 = arith.constant 0 : i32
    %c0_i32_1 = arith.constant 0 : i32
    return %c0_i32, %c0_i32_0 : i32, i32
  }
  func.func @transform_7(%arg0: i32) -> (i32, i32) {
    %c0_i32 = arith.constant 0 : i32
    %c0_i32_0 = arith.constant 0 : i32
    %c0_i32_1 = arith.constant 0 : i32
    return %c0_i32, %c0_i32_0 : i32, i32
  }
  func.func @transform_8(%arg0: i32) -> (i32, i32) {
    %c0_i32 = arith.constant 0 : i32
    %c0_i32_0 = arith.constant 0 : i32
    return %c0_i32, %arg0 : i32, i32
  }
}

</mosaic_0001>

<bundles_post_ra>
// kernel: decoder_forward.1
= control target key start
LH: loop header
LB: loop body
LE: loop exit
PB: predicated region body
PF: predicated region fallthrough
CT: control target
= control target key end

     0   :  { %v5593_v1 = vmov 0   ;;  %vm1274_vm0 = vcmask 523264   ;;  %vm4249_vm1 = vmmov 0   ;;  %vm3137_vm2 = vcmask 261120   ;;  %s5584_s0 = inlined_call_operand.vmem [shape: bf16[1728,128], index: 0, kind: input, shape index: {}]   ;;  %s5585_s2 = inlined_call_operand.vmem [shape: bf16[64,1728], index: 2, kind: input, shape index: {}]   ;;  %s5586_s5 = inlined_call_operand.vmem [shape: f32[64,1], index: 5, kind: input, shape index: {}]   ;;  %s5587_s6 = inlined_call_operand.vmem [shape: f32[32,1], index: 6, kind: input, shape index: {}]   ;;  %s5588_s7 = inlined_call_operand.vmem [shape: f32[8,1], index: 7, kind: input, shape index: {}]   ;;  %s5589_s1 = inlined_call_operand.vmem [shape: bf16[128,1152], index: 1, kind: input, shape index: {}]   ;;  %s5590_s3 = inlined_call_operand.vmem [shape: bf16[32,576], index: 3, kind: input, shape index: {}]   ;;  %s5591_s4 = inlined_call_operand.vmem [shape: bf16[8,288], index: 4, kind: input, shape index: {}]   ;;  %s5592_s8 = inlined_call_operand.vmem [shape: f32[8,128], index: 8, kind: output, shape index: {}]  }
   0x1   :  { %v3900_v0 = vld [vmem:[%s5584_s0 + $0x40] sm:$0xff]   ;;  %3898 = vset.pattern.permute.xlu0 %v5593_v1  ;;  %3899 = vset.pattern.permute.xlu1 %v5593_v1  ;;  %v3904_v5 = vld [vmem:[%s5584_s0 + $0x48] sm:$0xff]   ;;  %v3908_v9 = vld [vmem:[%s5584_s0 + $0x50] sm:$0xff]  }
   0x2   :  { %v3901_v2 = vld [vmem:[%s5584_s0] sm:$0xff]   ;;  %3482 = vmatprep.subr.bf16.mxu0 %v3900_v0  ;;  %v3905_v6 = vld [vmem:[%s5584_s0 + $0x8] sm:$0xff]   ;;  %v3909_v10 = vld [vmem:[%s5584_s0 + $0x10] sm:$0xff]  }
   0x3   :  { %v3902_v3 = vld [vmem:[%s5584_s0 + $0xc0] sm:$0xff]   ;;  %3483 = vmatpush3.bf16.msra.mxu0 %v3901_v2  ;;  %v3906_v7 = vld [vmem:[%s5584_s0 + $0xc8] sm:$0xff]   ;;  %v3910_v11 = vld [vmem:[%s5584_s0 + $0xd0] sm:$0xff]  }
   0x4   :  { %v3903_v4 = vld [vmem:[%s5584_s0 + $0x80] sm:$0xff]   ;;  %3522 = vmatprep.subr.bf16.mxu1 %v3902_v3  ;;  %3484 = vmatprep.subr.bf16.mxu0 %v3904_v5  ;;  %v3907_v8 = vld [vmem:[%s5584_s0 + $0x88] sm:$0xff]   ;;  %v3911_v12 = vld [vmem:[%s5584_s0 + $0x90] sm:$0xff]  }
   0x5   :  { %3523 = vmatpush3.bf16.msra.mxu1 %v3903_v4  ;;  %v3912_v13 = vld [vmem:[%s5584_s0 + $0x58] sm:$0xff]   ;;  %v3916_v17 = vld [vmem:[%s5584_s0 + $0x60] sm:$0xff]   ;;  %v3920_v21 = vld [vmem:[%s5584_s0 + $0x68] sm:$0xff]  }
   0x6   :  { %3524 = vmatprep.subr.bf16.mxu1 %v3906_v7  ;;  %v3913_v14 = vld [vmem:[%s5584_s0 + $0x18] sm:$0xff]   ;;  %v3917_v18 = vld [vmem:[%s5584_s0 + $0x20] sm:$0xff]   ;;  %v3921_v22 = vld [vmem:[%s5584_s0 + $0x28] sm:$0xff]  }
   0x7   :  { %3485 = vmatpush3.bf16.msra.mxu0 %v3905_v6  ;;  %v3914_v15 = vld [vmem:[%s5584_s0 + $0xd8] sm:$0xff]   ;;  %v3918_v19 = vld [vmem:[%s5584_s0 + $0xe0] sm:$0xff]   ;;  %v3922_v23 = vld [vmem:[%s5584_s0 + $0xe8] sm:$0xff]  }
   0x8   :  { %3486 = vmatprep.subr.bf16.mxu0 %v3908_v9  ;;  %v3915_v16 = vld [vmem:[%s5584_s0 + $0x98] sm:$0xff]   ;;  %v3919_v20 = vld [vmem:[%s5584_s0 + $0xa0] sm:$0xff]   ;;  %v3923_v24 = vld [vmem:[%s5584_s0 + $0xa8] sm:$0xff]  }
   0x9   :  { %3525 = vmatpush3.bf16.msra.mxu1 %v3907_v8  ;;  %v3924_v25 = vld [vmem:[%s5584_s0 + $0x70] sm:$0xff]   ;;  %v3928_v29 = vld [vmem:[%s5584_s0 + $0x78] sm:$0xff]   ;;  %v3935_v35 = vld [vmem:[%s5584_s0 + $0x140] sm:$0xff]  }
   0xa   :  { %3526 = vmatprep.subr.bf16.mxu1 %v3910_v11  ;;  %v3925_v26 = vld [vmem:[%s5584_s0 + $0x30] sm:$0xff]   ;;  %v3929_v30 = vld [vmem:[%s5584_s0 + $0x38] sm:$0xff]   ;;  %v3936_v36 = vld [vmem:[%s5585_s2 + $0x8] ss:$56 sps:$4 sm:$0xff]  }
   0xb   :  { %3487 = vmatpush3.bf16.msra.mxu0 %v3909_v10  ;;  %v3926_v27 = vld [vmem:[%s5584_s0 + $0xf0] sm:$0xff]   ;;  %v3930_v31 = vld [vmem:[%s5584_s0 + $0xf8] sm:$0xff]   ;;  %v3938_v37 = vld [vmem:[%s5585_s2 + $0xc] ss:$56 sps:$4 sm:$0xff]  }
   0xc   :  { %3488 = vmatprep.subr.bf16.mxu0 %v3912_v13  ;;  %v3927_v28 = vld [vmem:[%s5584_s0 + $0xb0] sm:$0xff]   ;;  %v3931_v32 = vld [vmem:[%s5585_s2] ss:$56 sps:$4 sm:$0xff]   ;;  %v3933_v33 = vld [vmem:[%s5585_s2 + $0x4] ss:$56 sps:$4 sm:$0xff]   ;;  %1384 = vmatprep.mubr.bf16.mxu1 %v3938_v37 }
   0xd   :  { %3527 = vmatpush3.bf16.msra.mxu1 %v3911_v12  ;;  %v3934_v34 = vld [vmem:[%s5584_s0 + $0xb8] sm:$0xff]   ;;  %1319 = vmatprep.mubr.bf16.mxu0 %v3933_v33  ;;  %v3939_v38 = vld [vmem:[%s5584_s0 + $0x100] sm:$0xff]   ;;  %v3942_v41 = vld [vmem:[%s5584_s0 + $0x148] sm:$0xff]  }
   0xe   :  { %3528 = vmatprep.subr.bf16.mxu1 %v3914_v15  ;;  %v3940_v39 = vld [vmem:[%s5584_s0 + $0x1c0] sm:$0xff]   ;;  %v3943_v42 = vld [vmem:[%s5584_s0 + $0x108] sm:$0xff]   ;;  %v3949_v47 = vld [vmem:[%s5584_s0 + $0x150] sm:$0xff]  }
   0xf   :  { %3489 = vmatpush3.bf16.msra.mxu0 %v3913_v14  ;;  %v3941_v40 = vld [vmem:[%s5584_s0 + $0x180] sm:$0xff]   ;;  %v3944_v43 = vld [vmem:[%s5584_s0 + $0x1c8] sm:$0xff]   ;;  %v3950_v48 = vld [vmem:[%s5585_s2 + $0x7c] ss:$56 sps:$4 sm:$0xff]  }
  0x10   :  { %3490 = vmatprep.subr.bf16.mxu0 %v3916_v17  ;;  %v3945_v44 = vld [vmem:[%s5585_s2 + $0x74] ss:$56 sps:$4 sm:$0xff]   ;;  %v3948_v46 = vld [vmem:[%s5585_s2 + $0x70] ss:$56 sps:$4 sm:$0xff]   ;;  %v3956_v53 = vld [vmem:[%s5584_s0 + $0x158] sm:$0xff]  }
  0x11   :  { %3529 = vmatpush3.bf16.msra.mxu1 %v3915_v16  ;;  %v3947_v45 = vld [vmem:[%s5584_s0 + $0x188] sm:$0xff]   ;;  %v3952_v49 = vld [vmem:[%s5584_s0 + $0x110] sm:$0xff]   ;;  %v3957_v54 = vld [vmem:[%s5584_s0 + $0x118] sm:$0xff]  }
  0x12   :  { %3530 = vmatprep.subr.bf16.mxu1 %v3918_v19  ;;  %v3953_v50 = vld [vmem:[%s5585_s2 + $0x78] ss:$56 sps:$4 sm:$0xff]   ;;  %v3959_v56 = vld [vmem:[%s5585_s2 + $0xe4] ss:$56 sps:$4 sm:$0xff]   ;;  %v3967_v62 = vld [vmem:[%s5585_s2 + $0xe8] ss:$56 sps:$4 sm:$0xff]  }
  0x13   :  { %3491 = vmatpush3.bf16.msra.mxu0 %v3917_v18  ;;  %v3954_v51 = vld [vmem:[%s5584_s0 + $0x1d0] sm:$0xff]   ;;  %v3958_v55 = vld [vmem:[%s5584_s0 + $0x1d8] sm:$0xff]   ;;  %v3963_v59 = vld [vmem:[%s5584_s0 + $0x160] sm:$0xff]  }
  0x14   :  { %3492 = vmatprep.subr.bf16.mxu0 %v3920_v21  ;;  %v3955_v52 = vld [vmem:[%s5584_s0 + $0x190] sm:$0xff]   ;;  %v3961_v57 = vld [vmem:[%s5584_s0 + $0x198] sm:$0xff]   ;;  %v3964_v60 = vld [vmem:[%s5585_s2 + $0xec] ss:$56 sps:$4 sm:$0xff]  }
  0x15   :  { %3531 = vmatpush3.bf16.msra.mxu1 %v3919_v20  ;;  %v3962_v58 = vld [vmem:[%s5585_s2 + $0xe0] ss:$56 sps:$4 sm:$0xff]   ;;  %v3970_v2 = vld [vmem:[%s5584_s0 + $0x168] sm:$0xff]   ;;  %v3977_v8 = vld [vmem:[%s5584_s0 + $0x170] sm:$0xff]  }
  0x16   :  { %3532 = vmatprep.subr.bf16.mxu1 %v3922_v23  ;;  %v3966_v61 = vld [vmem:[%s5584_s0 + $0x120] sm:$0xff]   ;;  %v3971_v3 = vld [vmem:[%s5584_s0 + $0x128] sm:$0xff]   ;;  %v3978_v9 = vld [vmem:[%s5585_s2 + $0x15c] ss:$56 sps:$4 sm:$0xff]  }
  0x17   :  { %3493 = vmatpush3.bf16.msra.mxu0 %v3921_v22  ;;  %v3968_v63 = vld [vmem:[%s5584_s0 + $0x1e0] sm:$0xff]   ;;  %v3972_v4 = vld [vmem:[%s5584_s0 + $0x1e8] sm:$0xff]   ;;  %v3980_v10 = vld [vmem:[%s5584_s0 + $0x130] sm:$0xff]  }
  0x18   :  { %3494 = vmatprep.subr.bf16.mxu0 %v3924_v25  ;;  %v3969_v0 = vld [vmem:[%s5584_s0 + $0x1a0] sm:$0xff]   ;;  %v3973_v5 = vld [vmem:[%s5585_s2 + $0x154] ss:$56 sps:$4 sm:$0xff]   ;;  %v3976_v7 = vld [vmem:[%s5585_s2 + $0x150] ss:$56 sps:$4 sm:$0xff]  }
  0x19   :  { %3533 = vmatpush3.bf16.msra.mxu1 %v3923_v24  ;;  %v3975_v6 = vld [vmem:[%s5584_s0 + $0x1a8] sm:$0xff]   ;;  %v3981_v11 = vld [vmem:[%s5585_s2 + $0x158] ss:$56 sps:$4 sm:$0xff]   ;;  %v3991_v20 = vld [vmem:[%s5584_s0 + $0x240] sm:$0xff]  }
  0x1a   :  { %3534 = vmatprep.subr.bf16.mxu1 %v3926_v27  ;;  %v3982_v12 = vld [vmem:[%s5584_s0 + $0x1f0] sm:$0xff]   ;;  %v3984_v14 = vld [vmem:[%s5584_s0 + $0x178] sm:$0xff]   ;;  %v3995_v23 = vld [vmem:[%s5584_s0 + $0x200] sm:$0xff]  }
  0x1b   :  { %3495 = vmatpush3.bf16.msra.mxu0 %v3925_v26  ;;  %v3983_v13 = vld [vmem:[%s5584_s0 + $0x1b0] sm:$0xff]   ;;  %v3985_v15 = vld [vmem:[%s5584_s0 + $0x138] sm:$0xff]   ;;  %v3996_v24 = vld [vmem:[%s5584_s0 + $0x2c0] sm:$0xff]  }
  0x1c   :  { %3496 = vmatprep.subr.bf16.mxu0 %v3928_v29  ;;  %v3986_v16 = vld [vmem:[%s5584_s0 + $0x1f8] sm:$0xff]   ;;  %v3987_v17 = vld [vmem:[%s5585_s2 + $0x10] ss:$56 sps:$4 sm:$0xff]   ;;  %v3989_v18 = vld [vmem:[%s5585_s2 + $0x14] ss:$56 sps:$4 sm:$0xff]  }
  0x1d   :  { %3535 = vmatpush3.bf16.msra.mxu1 %v3927_v28  ;;  %v3990_v19 = vld [vmem:[%s5584_s0 + $0x1b8] sm:$0xff]   ;;  %v3997_v25 = vld [vmem:[%s5584_s0 + $0x280] sm:$0xff]   ;;  %v3998_v26 = vld [vmem:[%s5584_s0 + $0x248] sm:$0xff]  }
  0x1e   :  { %3536 = vmatprep.subr.bf16.mxu1 %v3930_v31  ;;  %v3992_v21 = vld [vmem:[%s5585_s2 + $0x18] ss:$56 sps:$4 sm:$0xff]   ;;  %v3994_v22 = vld [vmem:[%s5585_s2 + $0x1c] ss:$56 sps:$4 sm:$0xff]   ;;  %v3999_v27 = vld [vmem:[%s5584_s0 + $0x208] sm:$0xff]  }
  0x1f   :  { %3497 = vmatpush3.bf16.msra.mxu0 %v3929_v30  ;;  %v4000_v28 = vld [vmem:[%s5584_s0 + $0x2c8] sm:$0xff]   ;;  %v4001_v29 = vld [vmem:[%s5585_s2 + $0x84] ss:$56 sps:$4 sm:$0xff]   ;;  %v4004_v31 = vld [vmem:[%s5585_s2 + $0x80] ss:$56 sps:$4 sm:$0xff]  }
  0x20   :  { %3562 = vmatprep.subr.bf16.mxu0 %v3935_v35  ;;  %v4003_v30 = vld [vmem:[%s5584_s0 + $0x288] sm:$0xff]   ;;  %v4011_v37 = vld [vmem:[%s5584_s0 + $0x290] sm:$0xff]  }
  0x21   :  { %3537 = vmatpush3.bf16.msra.mxu1 %v3934_v34  ;;  %v4006_v33 = vld [vmem:[%s5585_s2 + $0x8c] ss:$56 sps:$4 sm:$0xff]   ;;  %v4008_v34 = vld [vmem:[%s5584_s0 + $0x210] sm:$0xff]   ;;  %v4009_v35 = vld [vmem:[%s5585_s2 + $0x88] ss:$56 sps:$4 sm:$0xff]  }
  0x22   :  { %1320 = vmatmul.mubr.bf16.vlgmr.msra.gmra.mrb[0].mxu0 %v3931_v32  ;;  %3602 = vmatprep.subr.bf16.mxu1 %v3940_v39  ;;  %v4005_v32 = vld [vmem:[%s5584_s0 + $0x250] sm:$0xff]   ;;  %v4013_v39 = vld [vmem:[%s5584_s0 + $0x218] sm:$0xff]  }
  0x23   :  { %3563 = vmatpush3.bf16.msra.mxu0 %v3939_v38  ;;  %1327 = vmatprep.mubr.bf16.mxu0 %v3945_v44  ;;  %v4012_v38 = vld [vmem:[%s5584_s0 + $0x258] sm:$0xff]   ;;  %v4019_v44 = vld [vmem:[%s5584_s0 + $0x260] sm:$0xff]  }
  0x24   :  { %1385 = vmatmul.mubr.bf16.vlgmr.msra.gmra.mrb[0].mxu1 %v3936_v36  ;;  %3564 = vmatprep.subr.bf16.mxu0 %v3942_v41  ;;  %v4010_v36 = vld [vmem:[%s5584_s0 + $0x2d0] sm:$0xff]  }
  0x25   :  { %3603 = vmatpush3.bf16.msra.mxu1 %v3941_v40  ;;  %1392 = vmatprep.mubr.bf16.mxu1 %v3950_v48  ;;  %v4014_v40 = vld [vmem:[%s5584_s0 + $0x2d8] sm:$0xff]   ;;  %v4015_v41 = vld [vmem:[%s5585_s2 + $0xf4] ss:$56 sps:$4 sm:$0xff]   ;;  %v4024_v48 = vld [vmem:[%s5584_s0 + $0x2e0] sm:$0xff]  }
  0x26   :  { %3604 = vmatprep.subr.bf16.mxu1 %v3944_v43  ;;  %v4018_v43 = vld [vmem:[%s5585_s2 + $0xf0] ss:$56 sps:$4 sm:$0xff]  }
  0x27   :  { %3565 = vmatpush3.bf16.msra.mxu0 %v3943_v42  ;;  %v4017_v42 = vld [vmem:[%s5584_s0 + $0x298] sm:$0xff]  }
  0x28   :  { %3566 = vmatprep.subr.bf16.mxu0 %v3949_v47  ;;  %v4023_v47 = vld [vmem:[%s5585_s2 + $0xf8] ss:$56 sps:$4 sm:$0xff]  }
  0x29   :  { %3605 = vmatpush3.bf16.msra.mxu1 %v3947_v45  ;;  %v4020_v45 = vld [vmem:[%s5585_s2 + $0xfc] ss:$56 sps:$4 sm:$0xff]  }
  0x2a   :  { %1328 = vmatmul.mubr.bf16.gmra.mrb[4].mxu0 %v3948_v46  ;;  %3606 = vmatprep.subr.bf16.mxu1 %v3954_v51  ;;  %v4022_v46 = vld [vmem:[%s5584_s0 + $0x220] sm:$0xff]   ;;  %v4027_v51 = vld [vmem:[%s5584_s0 + $0x228] sm:$0xff]  }
  0x2b   :  { %3567 = vmatpush3.bf16.msra.mxu0 %v3952_v49  ;;  %1335 = vmatprep.mubr.bf16.mxu0 %v3959_v56  ;;  %v4025_v49 = vld [vmem:[%s5584_s0 + $0x2a0] sm:$0xff]   ;;  %v4033_v56 = vld [vmem:[%s5584_s0 + $0x270] sm:$0xff]  }
  0x2c   :  { %1393 = vmatmul.mubr.bf16.gmra.mrb[4].mxu1 %v3953_v50  ;;  %3568 = vmatprep.subr.bf16.mxu0 %v3956_v53  ;;  %v4026_v50 = vld [vmem:[%s5584_s0 + $0x268] sm:$0xff]   ;;  %v4029_v53 = vld [vmem:[%s5585_s2 + $0x164] ss:$56 sps:$4 sm:$0xff]  }
  0x2d   :  { %3607 = vmatpush3.bf16.msra.mxu1 %v3955_v52  ;;  %1400 = vmatprep.mubr.bf16.mxu1 %v3964_v60  ;;  %v4028_v52 = vld [vmem:[%s5584_s0 + $0x2e8] sm:$0xff]   ;;  %v4038_v60 = vld [vmem:[%s5584_s0 + $0x2f0] sm:$0xff]  }
  0x2e   :  { %3608 = vmatprep.subr.bf16.mxu1 %v3958_v55  ;;  %v4032_v55 = vld [vmem:[%s5585_s2 + $0x160] ss:$56 sps:$4 sm:$0xff]  }
  0x2f   :  { %3569 = vmatpush3.bf16.msra.mxu0 %v3957_v54  ;;  %v4031_v54 = vld [vmem:[%s5584_s0 + $0x2a8] sm:$0xff]  }
  0x30   :  { %3570 = vmatprep.subr.bf16.mxu0 %v3963_v59  ;;  %v4037_v59 = vld [vmem:[%s5585_s2 + $0x168] ss:$56 sps:$4 sm:$0xff]  }
  0x31   :  { %3609 = vmatpush3.bf16.msra.mxu1 %v3961_v57  ;;  %v4034_v57 = vld [vmem:[%s5585_s2 + $0x16c] ss:$56 sps:$4 sm:$0xff]  }
  0x32   :  { %1336 = vmatmul.mubr.bf16.gmra.mrb[8].mxu0 %v3962_v58  ;;  %3610 = vmatprep.subr.bf16.mxu1 %v3968_v63  ;;  %v4036_v58 = vld [vmem:[%s5584_s0 + $0x230] sm:$0xff]   ;;  %v4041_v63 = vld [vmem:[%s5584_s0 + $0x238] sm:$0xff]  }
  0x33   :  { %3571 = vmatpush3.bf16.msra.mxu0 %v3966_v61  ;;  %1343 = vmatprep.mubr.bf16.mxu0 %v3973_v5  ;;  %v4039_v61 = vld [vmem:[%s5584_s0 + $0x2b0] sm:$0xff]   ;;  %v4047_v5 = vld [vmem:[%s5585_s2 + $0x28] ss:$56 sps:$4 sm:$0xff]  }
  0x34   :  { %1401 = vmatmul.mubr.bf16.gmra.mrb[8].mxu1 %v3967_v62  ;;  %3572 = vmatprep.subr.bf16.mxu0 %v3970_v2  ;;  %v4040_v62 = vld [vmem:[%s5584_s0 + $0x278] sm:$0xff]  }
  0x35   :  { %3611 = vmatpush3.bf16.msra.mxu1 %v3969_v0  ;;  %1408 = vmatprep.mubr.bf16.mxu1 %v3978_v9  ;;  %v4042_v0 = vld [vmem:[%s5584_s0 + $0x2f8] sm:$0xff]   ;;  %v4052_v9 = vld [vmem:[%s5585_s2 + $0x94] ss:$56 sps:$4 sm:$0xff]  }
  0x36   :  { %3612 = vmatprep.subr.bf16.mxu1 %v3972_v4  ;;  %v4043_v2 = vld [vmem:[%s5585_s2 + $0x20] ss:$56 sps:$4 sm:$0xff]  }
  0x37   :  { %3573 = vmatpush3.bf16.msra.mxu0 %v3971_v3  ;;  %v4045_v3 = vld [vmem:[%s5585_s2 + $0x24] ss:$56 sps:$4 sm:$0xff]  }
  0x38   :  { %3574 = vmatprep.subr.bf16.mxu0 %v3977_v8  ;;  %v4046_v4 = vld [vmem:[%s5584_s0 + $0x2b8] sm:$0xff]   ;;  %v4051_v8 = vld [vmem:[%s5584_s0 + $0x308] sm:$0xff]  }
  0x39   :  { %3613 = vmatpush3.bf16.msra.mxu1 %v3975_v6  ;;  %v4049_v6 = vld [vmem:[%s5585_s2 + $0x2c] ss:$56 sps:$4 sm:$0xff]  }
  0x3a   :  { %1344 = vmatmul.mubr.bf16.gmra.mrb[12].mxu0 %v3976_v7  ;;  %3614 = vmatprep.subr.bf16.mxu1 %v3982_v12  ;;  %v4050_v7 = vld [vmem:[%s5584_s0 + $0x300] sm:$0xff]   ;;  %v4057_v12 = vld [vmem:[%s5584_s0 + $0x310] sm:$0xff]  }
  0x3b   :  { %3575 = vmatpush3.bf16.msra.mxu0 %v3980_v10  ;;  %1449 = vmatprep.mubr.bf16.mxu0 %v3989_v18  ;;  %v4054_v10 = vld [vmem:[%s5585_s2 + $0x90] ss:$56 sps:$4 sm:$0xff]   ;;  %v4062_v18 = vld [vmem:[%s5585_s2 + $0x100] ss:$56 sps:$4 sm:$0xff]  }
  0x3c   :  { %1409 = vmatmul.mubr.bf16.gmra.mrb[12].mxu1 %v3981_v11  ;;  %3576 = vmatprep.subr.bf16.mxu0 %v3984_v14  ;;  %v4055_v11 = vld [vmem:[%s5585_s2 + $0x9c] ss:$56 sps:$4 sm:$0xff]  }
  0x3d   :  { %3615 = vmatpush3.bf16.msra.mxu1 %v3983_v13  ;;  %1514 = vmatprep.mubr.bf16.mxu1 %v3994_v22  ;;  %v4058_v13 = vld [vmem:[%s5585_s2 + $0x98] ss:$56 sps:$4 sm:$0xff]   ;;  %v4060_v14 = vld [vmem:[%s5585_s2 + $0x104] ss:$56 sps:$4 sm:$0xff]   ;;  %v4066_v22 = vld [vmem:[%s5585_s2 + $0x108] ss:$56 sps:$4 sm:$0xff]  }
  0x3e   :  { %3616 = vmatprep.subr.bf16.mxu1 %v3986_v16  ;;  %v4059_v16 = vld [vmem:[%s5584_s0 + $0x318] sm:$0xff]  }
  0x3f   :  { %3577 = vmatpush3.bf16.msra.mxu0 %v3985_v15  ;;  %v4063_v15 = vld [vmem:[%s5585_s2 + $0x10c] ss:$56 sps:$4 sm:$0xff]  }
  0x40   :  { %3642 = vmatprep.subr.bf16.mxu0 %v3991_v20  ;;  %v303_v20 = vld [vmem:[%s5586_s5 + $0x8] sm:$0xff] }
  0x41   :  { %3617 = vmatpush3.bf16.msra.mxu1 %v3990_v19  ;;  %v4068_v19 = vld [vmem:[%s5585_s2 + $0x174] ss:$56 sps:$4 sm:$0xff]  }
  0x42   :  { %1450 = vmatmul.mubr.bf16.vlgmr.msra.gmra.mrb[16].mxu0 %v3987_v17  ;;  %3682 = vmatprep.subr.bf16.mxu1 %v3996_v24  ;;  %v302_v17 = vld [vmem:[%s5586_s5] sm:$0xff]  ;;  %v4071_v24 = vld [vmem:[%s5585_s2 + $0x17c] ss:$56 sps:$4 sm:$0xff]  }
  0x43   :  { %3643 = vmatpush3.bf16.msra.mxu0 %v3995_v23  ;;  %1457 = vmatprep.mubr.bf16.mxu0 %v4001_v29  ;;  %v304_v23 = vld [vmem:[%s5586_s5 + $0x10] sm:$0xff] }
  0x44   :  { %1515 = vmatmul.mubr.bf16.vlgmr.msra.gmra.mrb[16].mxu1 %v3992_v21  ;;  %3644 = vmatprep.subr.bf16.mxu0 %v3998_v26  ;;  %v4065_v21 = vld [vmem:[%s5584_s0 + $0x320] sm:$0xff]   ;;  %v305_v26 = vld [vmem:[%s5586_s5 + $0x18] sm:$0xff]  ;;  %v4073_v29 = vld [vmem:[%s5584_s0 + $0x330] sm:$0xff]  }
  0x45   :  { %3683 = vmatpush3.bf16.msra.mxu1 %v3997_v25  ;;  %1522 = vmatprep.mubr.bf16.mxu1 %v4006_v33  ;;  %v4067_v25 = vld [vmem:[%s5584_s0 + $0x328] sm:$0xff]  }
  0x46   :  { %3684 = vmatprep.subr.bf16.mxu1 %v4000_v28  ;;  %312 = vperm.xlu0 %3898, %v302_v17   ;;  %v306_v28 = vld [vmem:[%s5586_s5 + $0x20] sm:$0xff]  ;;  %v4082_v33 = vld [vmem:[%s5585_s2 + $0x34] ss:$56 sps:$4 sm:$0xff]  }
  0x47   :  { %3645 = vmatpush3.bf16.msra.mxu0 %v3999_v27  ;;  %322 = vperm.xlu1 %3899, %v304_v23   ;;  %v4070_v27 = vld [vmem:[%s5585_s2 + $0x170] ss:$56 sps:$4 sm:$0xff]   ;;  %v4130_v23 = vld [vmem:[%s5589_s1 + $0x1b4] ss:$36 sps:$4 sm:$0xff]  }
  0x48   :  { %3646 = vmatprep.subr.bf16.mxu0 %v4005_v32  ;;  %v4074_v32 = vld [vmem:[%s5585_s2 + $0x178] ss:$56 sps:$4 sm:$0xff]  }
  0x49   :  { %3685 = vmatpush3.bf16.msra.mxu1 %v4003_v30  ;;  %v307_v30 = vld [vmem:[%s5586_s5 + $0x28] sm:$0xff] }
  0x4a   :  { %1458 = vmatmul.mubr.bf16.gmra.mrb[20].mxu0 %v4004_v31  ;;  %3686 = vmatprep.subr.bf16.mxu1 %v4010_v36  ;;  %v308_v31 = vld [vmem:[%s5586_s5 + $0x30] sm:$0xff]  ;;  %v2607_v36 = vld [vmem:[%s5587_s6] sm:$0xff] }
  0x4b   :  { %3647 = vmatpush3.bf16.msra.mxu0 %v4008_v34  ;;  %1465 = vmatprep.mubr.bf16.mxu0 %v4015_v41  ;;  %v4075_v34 = vld [vmem:[%s5584_s0 + $0x338] sm:$0xff]   ;;  %v3121_v41 = vld [vmem:[%s5588_s7] sm:$0xff] }
  0x4c   :  { %1523 = vmatmul.mubr.bf16.gmra.mrb[20].mxu1 %v4009_v35  ;;  %3648 = vmatprep.subr.bf16.mxu0 %v4012_v38  ;;  %v309_v35 = vld [vmem:[%s5586_s5 + $0x38] sm:$0xff]  ;;  %v2609_v38 = vld [vmem:[%s5587_s6 + $0x10] sm:$0xff] }
  0x4d   :  { %3687 = vmatpush3.bf16.msra.mxu1 %v4011_v37  ;;  %1530 = vmatprep.mubr.bf16.mxu1 %v4020_v45  ;;  %v4076_v37 = vld [vmem:[%s5584_s0 + $0x340] sm:$0xff]   ;;  %v4080_v45 = vld [vmem:[%s5585_s2 + $0x30] ss:$56 sps:$4 sm:$0xff]  }
  0x4e   :  { %3688 = vmatprep.subr.bf16.mxu1 %v4014_v40  ;;  %317 = vperm.xlu0 %3898, %v303_v20   ;;  %v4077_v40 = vld [vmem:[%s5584_s0 + $0x348] sm:$0xff]  }
  0x4f   :  { %3649 = vmatpush3.bf16.msra.mxu0 %v4013_v39  ;;  %327 = vperm.xlu1 %3899, %v305_v26   ;;  %v2608_v39 = vld [vmem:[%s5587_s6 + $0x8] sm:$0xff]  ;;  %v4128_v26 = vld [vmem:[%s5589_s1 + $0x1b0] ss:$36 sps:$4 sm:$0xff]  }
  0x50   :  { %3650 = vmatprep.subr.bf16.mxu0 %v4019_v44  ;;  %v4079_v44 = vld [vmem:[%s5584_s0 + $0x358] sm:$0xff]  }
  0x51   :  { %3689 = vmatpush3.bf16.msra.mxu1 %v4017_v42  ;;  %v2610_v42 = vld [vmem:[%s5587_s6 + $0x18] sm:$0xff] }
  0x52   :  { %1466 = vmatmul.mubr.bf16.gmra.mrb[24].mxu0 %v4018_v43  ;;  %3690 = vmatprep.subr.bf16.mxu1 %v4024_v48  ;;  %v4078_v43 = vld [vmem:[%s5584_s0 + $0x350] sm:$0xff]  }
  0x53   :  { %3651 = vmatpush3.bf16.msra.mxu0 %v4022_v46  ;;  %1473 = vmatprep.mubr.bf16.mxu0 %v4029_v53  ;;  %v4083_v46 = vld [vmem:[%s5585_s2 + $0xa4] ss:$56 sps:$4 sm:$0xff]   ;;  %v4086_v48 = vld [vmem:[%s5585_s2 + $0x114] ss:$56 sps:$4 sm:$0xff]  }
  0x54   :  { %1531 = vmatmul.mubr.bf16.gmra.mrb[24].mxu1 %v4023_v47  ;;  %3652 = vmatprep.subr.bf16.mxu0 %v4026_v50  ;;  %v4085_v47 = vld [vmem:[%s5585_s2 + $0xa0] ss:$56 sps:$4 sm:$0xff]   ;;  %v4089_v50 = vld [vmem:[%s5585_s2 + $0x184] ss:$56 sps:$4 sm:$0xff]  }
  0x55   :  { %3691 = vmatpush3.bf16.msra.mxu1 %v4025_v49  ;;  %1538 = vmatprep.mubr.bf16.mxu1 %v4034_v57  ;;  %v4088_v49 = vld [vmem:[%s5585_s2 + $0x110] ss:$56 sps:$4 sm:$0xff]   ;;  %v4103_v57 = vld [vmem:[%s5589_s1 + $0x5c] ss:$36 sps:$4 sm:$0xff]  }
  0x56   :  { %3692 = vmatprep.subr.bf16.mxu1 %v4028_v52  ;;  %332 = vperm.xlu0 %3898, %v306_v28   ;;  %v4092_v52 = vld [vmem:[%s5589_s1] ss:$36 sps:$4 sm:$0xff]  }
  0x57   :  { %3653 = vmatpush3.bf16.msra.mxu0 %v4027_v51  ;;  %337 = vperm.xlu1 %3899, %v307_v30   ;;  %v4091_v51 = vld [vmem:[%s5585_s2 + $0x180] ss:$56 sps:$4 sm:$0xff]   ;;  %v4094_v53 = vld [vmem:[%s5589_s1 + $0x4] ss:$36 sps:$4 sm:$0xff]   ;;  %v4139_v30 = vld [vmem:[%s5589_s1 + $0x20c] ss:$36 sps:$4 sm:$0xff]  }
  0x58   :  { %3654 = vmatprep.subr.bf16.mxu0 %v4033_v56  ;;  %v4100_v56 = vld [vmem:[%s5589_s1 + $0x4c] ss:$36 sps:$4 sm:$0xff]  }
  0x59   :  { %3693 = vmatpush3.bf16.msra.mxu1 %v4031_v54  ;;  %v4095_v54 = vld [vmem:[%s5589_s1 + $0x10] ss:$36 sps:$4 sm:$0xff]  }
  0x5a   :  { %1474 = vmatmul.mubr.bf16.gmra.mrb[28].mxu0 %v4032_v55  ;;  %3694 = vmatprep.subr.bf16.mxu1 %v4038_v60  ;;  %v4097_v55 = vld [vmem:[%s5589_s1 + $0x14] ss:$36 sps:$4 sm:$0xff]  }
  0x5b   :  { %3655 = vmatpush3.bf16.msra.mxu0 %v4036_v58  ;;  %1579 = vmatprep.mubr.bf16.mxu0 %v4045_v3  ;;  %v4098_v58 = vld [vmem:[%s5589_s1 + $0x48] ss:$36 sps:$4 sm:$0xff]   ;;  %v4104_v60 = vld [vmem:[%s5589_s1 + $0x90] ss:$36 sps:$4 sm:$0xff]   ;;  %v4110_v3 = vld [vmem:[%s5589_s1 + $0xd8] ss:$36 sps:$4 sm:$0xff]  }
  0x5c   :  { %1539 = vmatmul.mubr.bf16.gmra.mrb[28].mxu1 %v4037_v59  ;;  %3656 = vmatprep.subr.bf16.mxu0 %v4040_v62  ;;  %v4101_v59 = vld [vmem:[%s5589_s1 + $0x58] ss:$36 sps:$4 sm:$0xff]   ;;  %v4107_v62 = vld [vmem:[%s5589_s1 + $0xa0] ss:$36 sps:$4 sm:$0xff]  }
  0x5d   :  { %3695 = vmatpush3.bf16.msra.mxu1 %v4039_v61  ;;  %1644 = vmatprep.mubr.bf16.mxu1 %v4049_v6  ;;  %v4106_v61 = vld [vmem:[%s5589_s1 + $0x94] ss:$36 sps:$4 sm:$0xff]   ;;  %v4116_v6 = vld [vmem:[%s5589_s1 + $0x120] ss:$36 sps:$4 sm:$0xff]  }
  0x5e   :  { %3696 = vmatprep.subr.bf16.mxu1 %v4042_v0  ;;  %342 = vperm.xlu0 %3898, %v308_v31   ;;  %v4112_v0 = vld [vmem:[%s5589_s1 + $0xdc] ss:$36 sps:$4 sm:$0xff]  }
  0x5f   :  { %3657 = vmatpush3.bf16.msra.mxu0 %v4041_v63  ;;  %347 = vperm.xlu1 %3899, %v309_v35   ;;  %v4109_v63 = vld [vmem:[%s5589_s1 + $0xa4] ss:$36 sps:$4 sm:$0xff]  }
  0x60   :  { %1677 = vmatprep.subr.bf16.mxu0 %v5593_v1 }
  0x61   :  { %3697 = vmatpush3.bf16.msra.mxu1 %v4046_v4  ;;  %v4113_v4 = vld [vmem:[%s5589_s1 + $0xe8] ss:$36 sps:$4 sm:$0xff]  }
  0x62   :  { %1580 = vmatmul.mubr.bf16.vlgmr.msra.gmra.mrb[32].mxu0 %v4043_v2  ;;  %2613 = vperm.xlu0 %3898, %v2607_v36   ;;  %v4115_v2 = vld [vmem:[%s5589_s1 + $0xec] ss:$36 sps:$4 sm:$0xff]  }
  0x63   :  { %1678 = vmatpush1.bf16.msra.mxu0 %v4050_v7  ;;  %1587 = vmatprep.mubr.bf16.mxu0 %v4052_v9  ;;  %v4121_v7 = vld [vmem:[%s5589_s1 + $0x134] ss:$36 sps:$4 sm:$0xff]   ;;  %v4124_v9 = vld [vmem:[%s5589_s1 + $0x16c] ss:$36 sps:$4 sm:$0xff]  }
  0x64   :  { %1645 = vmatmul.mubr.bf16.vlgmr.msra.gmra.mrb[32].mxu1 %v4047_v5  ;;  %1679 = vmatprep.subr.bf16.mxu0 %v5593_v1  ;;  %v4118_v5 = vld [vmem:[%s5589_s1 + $0x124] ss:$36 sps:$4 sm:$0xff]  }
  0x65   :  { %1652 = vmatprep.mubr.bf16.mxu1 %v4055_v11  ;;  %2618 = vperm.xlu1 %3899, %v2608_v39   ;;  %v4122_v11 = vld [vmem:[%s5589_s1 + $0x168] ss:$36 sps:$4 sm:$0xff]  }
  0x66   :  { %2623 = vperm.xlu0 %3898, %v2609_v38   ;;  %2214 = vmatprep.subr.bf16.mxu1 %v4094_v53  ;;  %v4142_v39 = vld [vmem:[%s5589_s1 + $0xc] ss:$36 sps:$4 sm:$0xff]  }
  0x67   :  { %1680 = vmatpush1.bf16.msra.mxu0 %v4051_v8  ;;  %2215 = vmatpush1.bf16.msra.mxu1 %v4092_v52  ;;  %v4119_v8 = vld [vmem:[%s5589_s1 + $0x130] ss:$36 sps:$4 sm:$0xff]  }
  0x68   :  { %1681 = vmatprep.subr.bf16.mxu0 %v5593_v1  ;;  %2216 = vmatprep.subr.bf16.mxu1 %v4100_v56 }
  0x69   :  { %2628 = vperm.xlu1 %3899, %v2610_v42  }
  0x6a   :  { %1588 = vmatmul.mubr.bf16.gmra.mrb[36].mxu0 %v4054_v10  ;;  %3124 = vperm.xlu0 %3898, %v3121_v41   ;;  %v4127_v10 = vld [vmem:[%s5589_s1 + $0x17c] ss:$36 sps:$4 sm:$0xff]  }
  0x6b   :  { %1595 = vmatprep.mubr.bf16.mxu0 %v4060_v14  ;;  %1682 = vmatpush1.bf16.msra.mxu0 %v4057_v12 }
  0x6c   :  { %1653 = vmatmul.mubr.bf16.gmra.mrb[36].mxu1 %v4058_v13  ;;  %1683 = vmatprep.subr.bf16.mxu0 %v5593_v1  ;;  %v4125_v13 = vld [vmem:[%s5589_s1 + $0x178] ss:$36 sps:$4 sm:$0xff]  }
  0x6d   :  { %1660 = vmatprep.mubr.bf16.mxu1 %v4063_v15  ;;  %2217 = vmatpush1.bf16.msra.mxu1 %v4098_v58 }
  0x6e   :  { %2218 = vmatprep.subr.bf16.mxu1 %v4106_v61 }
  0x6f   :  { %1684 = vmatpush1.bf16.msra.mxu0 %v4059_v16 }
  0x70   :  { %1685 = vmatprep.subr.bf16.mxu0 %v5593_v1 }
  0x71   :  { %2219 = vmatpush1.bf16.msra.mxu1 %v4104_v60 }
  0x72   :  { %1596 = vmatmul.mubr.bf16.gmra.mrb[40].mxu0 %v4062_v18  ;;  %2220 = vmatprep.subr.bf16.mxu1 %v4112_v0 }
  0x73   :  { %1603 = vmatprep.mubr.bf16.mxu0 %v4068_v19  ;;  %1686 = vmatpush1.bf16.msra.mxu0 %v4065_v21 }
  0x74   :  { %1661 = vmatmul.mubr.bf16.gmra.mrb[40].mxu1 %v4066_v22  ;;  %1687 = vmatprep.subr.bf16.mxu0 %v5593_v1 }
  0x75   :  { %1668 = vmatprep.mubr.bf16.mxu1 %v4071_v24  ;;  %2221 = vmatpush1.bf16.msra.mxu1 %v4110_v3  ;;  %v4133_v24 = vld [vmem:[%s5589_s1 + $0x1c4] ss:$36 sps:$4 sm:$0xff]  }
  0x76   :  { %2222 = vmatprep.subr.bf16.mxu1 %v4118_v5 }
  0x77   :  { %1688 = vmatpush1.bf16.msra.mxu0 %v4067_v25 }
  0x78   :  { %1689 = vmatprep.subr.bf16.mxu0 %v5593_v1 }
  0x79   :  { %2223 = vmatpush1.bf16.msra.mxu1 %v4116_v6 }
  0x7a   :  { %1604 = vmatmul.mubr.bf16.gmra.mrb[44].mxu0 %v4070_v27  ;;  %2224 = vmatprep.subr.bf16.mxu1 %v4124_v9  ;;  %v4131_v27 = vld [vmem:[%s5589_s1 + $0x1c0] ss:$36 sps:$4 sm:$0xff]  }
  0x7b   :  { %3390 = vmatprep.mubr.msk.bf16.mxu0 %vm1274_vm0, %v4082_v33  ;;  %1690 = vmatpush1.bf16.msra.mxu0 %v4073_v29  ;;  %v4136_v29 = vld [vmem:[%s5589_s1 + $0x1fc] ss:$36 sps:$4 sm:$0xff]   ;;  %v4137_v33 = vld [vmem:[%s5589_s1 + $0x208] ss:$36 sps:$4 sm:$0xff]  }
  0x7c   :  { %1669 = vmatmul.mubr.bf16.gmra.mrb[44].mxu1 %v4074_v32  ;;  %1691 = vmatprep.subr.bf16.mxu0 %v5593_v1  ;;  %v4134_v32 = vld [vmem:[%s5589_s1 + $0x1f8] ss:$36 sps:$4 sm:$0xff]  }
  0x7d   :  { %2246 = vmatprep.mubr.bf16.mxu1 %v5593_v1  ;;  %2225 = vmatpush1.bf16.msra.mxu1 %v4122_v11 }
  0x7e   :  { %2226 = vmatprep.subr.bf16.mxu1 %v4130_v23 }
  0x7f   :  { %1692 = vmatpush1.bf16.msra.mxu0 %v4075_v34 }
  0x80   :  { %1693 = vmatprep.subr.bf16.mxu0 %v5593_v1 }
  0x81   :  { %2227 = vmatpush1.bf16.msra.mxu1 %v4128_v26 }
  0x82   :  { %2228 = vmatprep.subr.bf16.mxu1 %v4136_v29 }
  0x83   :  { %1694 = vmatpush1.bf16.msra.mxu0 %v4076_v37 }
  0x84   :  { %1695 = vmatprep.subr.bf16.mxu0 %v5593_v1 }
  0x85   :  { %2229 = vmatpush1.bf16.msra.mxu1 %v4134_v32 }
  0x86   :  { %2287 = vmatprep.subr.bf16.mxu1 %v4142_v39 }
  0x87   :  { %1696 = vmatpush1.bf16.msra.mxu0 %v4077_v40  ;;  %v4948_v40 = vld [vmem:[%s5589_s1 + $0x20] ss:$36 sps:$4 sm:$0xff]  }
  0x88   :  { %1697 = vmatprep.subr.bf16.mxu0 %v5593_v1 }
  0x8b   :  { %1698 = vmatpush1.bf16.msra.mxu0 %v4078_v43 }
  0x8c   :  { %1699 = vmatprep.subr.bf16.mxu0 %v5593_v1 }
  0x8f   :  { %1700 = vmatpush1.bf16.msra.mxu0 %v4079_v44 }
  0x90   :  { %2360 = vmatprep.subr.bf16.mxu0 %v4097_v55 }
  0x92   :  { %1710 = vmatmul.mubr.bf16.vlgmr.msra.gmra.mrb[48].mxu0 %v4080_v45 }
  0x93   :  { %3391 = vmatprep.mubr.msk.bf16.mxu0 %vm1274_vm0, %v4083_v46  ;;  %2361 = vmatpush1.bf16.msra.mxu0 %v4095_v54 }
  0x94   :  { %2362 = vmatprep.subr.bf16.mxu0 %v4103_v57 }
  0x97   :  { %2363 = vmatpush1.bf16.msra.mxu0 %v4101_v59 }
  0x98   :  { %2364 = vmatprep.subr.bf16.mxu0 %v4109_v63 }
  0x9a   :  { %1718 = vmatmul.mubr.bf16.gmra.mrb[52].mxu0 %v4085_v47 }
  0x9b   :  { %3392 = vmatprep.mubr.msk.bf16.mxu0 %vm1274_vm0, %v4086_v48  ;;  %2365 = vmatpush1.bf16.msra.mxu0 %v4107_v62 }
  0x9c   :  { %2366 = vmatprep.subr.bf16.mxu0 %v4115_v2 }
  0x9f   :  { %2367 = vmatpush1.bf16.msra.mxu0 %v4113_v4 }
  0xa0   :  { %2368 = vmatprep.subr.bf16.mxu0 %v4121_v7 }
  0xa2   :  { %1726 = vmatmul.mubr.bf16.gmra.mrb[56].mxu0 %v4088_v49 }
  0xa3   :  { %3393 = vmatprep.mubr.msk.bf16.mxu0 %vm1274_vm0, %v4089_v50  ;;  %2369 = vmatpush1.bf16.msra.mxu0 %v4119_v8 }
  0xa4   :  { %2370 = vmatprep.subr.bf16.mxu0 %v4127_v10 }
  0xa7   :  { %2371 = vmatpush1.bf16.msra.mxu0 %v4125_v13 }
  0xa8   :  { %2372 = vmatprep.subr.bf16.mxu0 %v4133_v24 }
  0xaa   :  { %1734 = vmatmul.mubr.bf16.gmra.mrb[60].mxu0 %v4091_v51 }
  0xab   :  { %2392 = vmatprep.mubr.bf16.mxu0 %v5593_v1  ;;  %2373 = vmatpush1.bf16.msra.mxu0 %v4131_v27 }
  0xac   :  { %2374 = vmatprep.subr.bf16.mxu0 %v4139_v30 }
  0xaf   :  { %2375 = vmatpush1.bf16.msra.mxu0 %v4137_v33 }
  0xb0   :  { %3831 = vmatprep.subr.bf16.mxu0 %v4948_v40 }
  0xc5   :  { %v313_v37 = vpop.permute.xlu0 %312 }
  0xc6   :  { %v323_v51 = vpop.permute.xlu1 %322 }
  0xcd   :  { %v318_v48 = vpop.permute.xlu0 %317 }
  0xce   :  { %v328_v58 = vpop.permute.xlu1 %327 }
  0xd5   :  { %v333_v57 = vpop.permute.xlu0 %332 }
  0xd6   :  { %v338_v8 = vpop.permute.xlu1 %337 }
  0xf5   :  { %v3498_v12 = vpop.f32.mrb[0].mxu0 }
  0xf6   :  { %v3499_v14 = vpop.f32.mrb[1].mxu0 }
  0xf7   :  { %v3500_v15 = vadd.f32 %v3499_v14, %v3498_v12  ;;  %v3501_v16 = vpop.f32.mrb[2].mxu0  ;;  %v3538_v17 = vpop.f32.mrb[0].mxu1 }
  0xf8   :  { %v3502_v18 = vpop.f32.mrb[3].mxu0  ;;  %v3539_v20 = vpop.f32.mrb[1].mxu1 }
  0xf9   :  { %v3503_v19 = vadd.f32 %v3502_v18, %v3501_v16  ;;  %v3540_v21 = vadd.f32 %v3539_v20, %v3538_v17  ;;  %v3541_v22 = vpop.f32.mrb[2].mxu1  ;;  %v1322_v41 = vadd.f32 %v3500_v15, %v313_v37  ;;  %v343_v16 = vpop.permute.xlu0 %342 }
  0xfa   :  { %v3542_v25 = vpop.f32.mrb[3].mxu1 }
  0xfb   :  { %v3543_v28 = vadd.f32 %v3542_v25, %v3541_v22  ;;  %v1387_v45 = vadd.f32 %v3540_v21, %v1322_v41  ;;  %v1325_v50 = vadd.f32 %v3503_v19, %v318_v48  ;;  %v348_v19 = vpop.permute.xlu1 %347 }
  0xfd   :  { %v3504_v31 = vpop.f32.mrb[4].mxu0  ;;  %v1390_v54 = vadd.f32 %v3543_v28, %v1325_v50 }
  0xfe   :  { %v3505_v34 = vpop.f32.mrb[5].mxu0 }
  0xff   :  { %v3506_v35 = vadd.f32 %v3505_v34, %v3504_v31  ;;  %v3507_v36 = vpop.f32.mrb[6].mxu0  ;;  %v3544_v42 = vpop.f32.mrb[4].mxu1 }
 0x100   :  { %v3508_v38 = vpop.f32.mrb[7].mxu0  ;;  %v3545_v44 = vpop.f32.mrb[5].mxu1 }
 0x101   :  { %v3509_v43 = vadd.f32 %v3508_v38, %v3507_v36  ;;  %v3546_v46 = vadd.f32 %v3545_v44, %v3544_v42  ;;  %v3547_v47 = vpop.f32.mrb[6].mxu1  ;;  %v1330_v53 = vadd.f32 %v3506_v35, %v323_v51 }
 0x102   :  { %v3548_v49 = vpop.f32.mrb[7].mxu1 }
 0x103   :  { %v3549_v52 = vadd.f32 %v3548_v49, %v3547_v47  ;;  %v1395_v55 = vadd.f32 %v3546_v46, %v1330_v53  ;;  %v1333_v60 = vadd.f32 %v3509_v43, %v328_v58 }
 0x105   :  { %v3510_v56 = vpop.f32.mrb[8].mxu0  ;;  %v1398_v2 = vadd.f32 %v3549_v52, %v1333_v60 }
 0x106   :  { %v3511_v59 = vpop.f32.mrb[9].mxu0 }
 0x107   :  { %v3512_v61 = vadd.f32 %v3511_v59, %v3510_v56  ;;  %v3513_v62 = vpop.f32.mrb[10].mxu0  ;;  %v3550_v63 = vpop.f32.mrb[8].mxu1 }
 0x108   :  { %v3514_v0 = vpop.f32.mrb[11].mxu0  ;;  %v3551_v5 = vpop.f32.mrb[9].mxu1 }
 0x109   :  { %v1338_v3 = vadd.f32 %v3512_v61, %v333_v57  ;;  %v3515_v4 = vadd.f32 %v3514_v0, %v3513_v62  ;;  %v3552_v6 = vadd.f32 %v3551_v5, %v3550_v63  ;;  %v3553_v7 = vpop.f32.mrb[10].mxu1 }
 0x10a   :  { %v3554_v10 = vpop.f32.mrb[11].mxu1 }
 0x10b   :  { %v1341_v9 = vadd.f32 %v3515_v4, %v338_v8  ;;  %v1403_v11 = vadd.f32 %v3552_v6, %v1338_v3  ;;  %v3555_v12 = vadd.f32 %v3554_v10, %v3553_v7 }
 0x10d   :  { %v1406_v13 = vadd.f32 %v3555_v12, %v1341_v9  ;;  %v3516_v14 = vpop.f32.mrb[12].mxu0 }
 0x10e   :  { %v3517_v15 = vpop.f32.mrb[13].mxu0 }
 0x10f   :  { %v3518_v17 = vadd.f32 %v3517_v15, %v3516_v14  ;;  %v3519_v18 = vpop.f32.mrb[14].mxu0  ;;  %v3556_v20 = vpop.f32.mrb[12].mxu1 }
 0x110   :  { %v3520_v21 = vpop.f32.mrb[15].mxu0  ;;  %v3557_v24 = vpop.f32.mrb[13].mxu1 }
 0x111   :  { %v1346_v22 = vadd.f32 %v3518_v17, %v343_v16  ;;  %v3521_v23 = vadd.f32 %v3520_v21, %v3519_v18  ;;  %v3558_v25 = vadd.f32 %v3557_v24, %v3556_v20  ;;  %v3559_v26 = vpop.f32.mrb[14].mxu1 }
 0x112   :  { %v3560_v28 = vpop.f32.mrb[15].mxu1 }
 0x113   :  { %v1349_v27 = vadd.f32 %v3521_v23, %v348_v19  ;;  %v1411_v29 = vadd.f32 %v3558_v25, %v1346_v22  ;;  %v3561_v30 = vadd.f32 %v3560_v28, %v3559_v26 }
 0x115   :  { %v1414_v31 = vadd.f32 %v3561_v30, %v1349_v27  ;;  %v3578_v32 = vpop.f32.mrb[16].mxu0 }
 0x116   :  { %v3579_v33 = vpop.f32.mrb[17].mxu0 }
 0x117   :  { %v3580_v34 = vadd.f32 %v3579_v33, %v3578_v32  ;;  %v3581_v35 = vpop.f32.mrb[18].mxu0  ;;  %v3618_v38 = vpop.f32.mrb[16].mxu1 }
 0x118   :  { %v3582_v36 = vpop.f32.mrb[19].mxu0  ;;  %v3619_v41 = vpop.f32.mrb[17].mxu1 }
 0x119   :  { %v1452_v37 = vadd.f32 %v3580_v34, %v1387_v45  ;;  %v3583_v39 = vadd.f32 %v3582_v36, %v3581_v35  ;;  %v3620_v43 = vadd.f32 %v3619_v41, %v3618_v38  ;;  %v3621_v44 = vpop.f32.mrb[18].mxu1 }
 0x11a   :  { %v3622_v46 = vpop.f32.mrb[19].mxu1 }
 0x11b   :  { %v1455_v42 = vadd.f32 %v3583_v39, %v1390_v54  ;;  %v1517_v47 = vadd.f32 %v3620_v43, %v1452_v37  ;;  %v3623_v48 = vadd.f32 %v3622_v46, %v3621_v44 }
 0x11d   :  { %v1520_v49 = vadd.f32 %v3623_v48, %v1455_v42  ;;  %v3584_v50 = vpop.f32.mrb[20].mxu0 }
 0x11e   :  { %v3585_v51 = vpop.f32.mrb[21].mxu0 }
 0x11f   :  { %v3586_v52 = vadd.f32 %v3585_v51, %v3584_v50  ;;  %v3587_v53 = vpop.f32.mrb[22].mxu0  ;;  %v3624_v56 = vpop.f32.mrb[20].mxu1 }
 0x120   :  { %v3588_v57 = vpop.f32.mrb[23].mxu0  ;;  %v3625_v60 = vpop.f32.mrb[21].mxu1 }
 0x121   :  { %v1460_v58 = vadd.f32 %v3586_v52, %v1395_v55  ;;  %v3589_v59 = vadd.f32 %v3588_v57, %v3587_v53  ;;  %v3626_v45 = vadd.f32 %v3625_v60, %v3624_v56  ;;  %v3627_v61 = vpop.f32.mrb[22].mxu1 }
 0x122   :  { %v3628_v63 = vpop.f32.mrb[23].mxu1 }
 0x123   :  { %v1463_v62 = vadd.f32 %v3589_v59, %v1398_v2  ;;  %v1525_v54 = vadd.f32 %v3626_v45, %v1460_v58  ;;  %v3629_v0 = vadd.f32 %v3628_v63, %v3627_v61 }
 0x125   :  { %v1528_v3 = vadd.f32 %v3629_v0, %v1463_v62  ;;  %v3590_v4 = vpop.f32.mrb[24].mxu0 }
 0x126   :  { %v3591_v5 = vpop.f32.mrb[25].mxu0 }
 0x127   :  { %v3592_v6 = vadd.f32 %v3591_v5, %v3590_v4  ;;  %v3593_v7 = vpop.f32.mrb[26].mxu0  ;;  %v3630_v8 = vpop.f32.mrb[24].mxu1 }
 0x128   :  { %v3594_v9 = vpop.f32.mrb[27].mxu0  ;;  %v3631_v14 = vpop.f32.mrb[25].mxu1 }
 0x129   :  { %v1468_v10 = vadd.f32 %v3592_v6, %v1403_v11  ;;  %v3595_v12 = vadd.f32 %v3594_v9, %v3593_v7  ;;  %v3632_v15 = vadd.f32 %v3631_v14, %v3630_v8  ;;  %v3633_v55 = vpop.f32.mrb[26].mxu1 }
 0x12a   :  { %v3634_v17 = vpop.f32.mrb[27].mxu1 }
 0x12b   :  { %v1471_v16 = vadd.f32 %v3595_v12, %v1406_v13  ;;  %v1533_v18 = vadd.f32 %v3632_v15, %v1468_v10  ;;  %v3635_v19 = vadd.f32 %v3634_v17, %v3633_v55 }
 0x12d   :  { %v1536_v2 = vadd.f32 %v3635_v19, %v1471_v16  ;;  %v3596_v20 = vpop.f32.mrb[28].mxu0 }
 0x12e   :  { %v3597_v21 = vpop.f32.mrb[29].mxu0 }
 0x12f   :  { %v3598_v22 = vadd.f32 %v3597_v21, %v3596_v20  ;;  %v3599_v23 = vpop.f32.mrb[30].mxu0  ;;  %v3636_v26 = vpop.f32.mrb[28].mxu1 }
 0x130   :  { %v3600_v24 = vpop.f32.mrb[31].mxu0  ;;  %v3637_v28 = vpop.f32.mrb[29].mxu1 }
 0x131   :  { %v1476_v25 = vadd.f32 %v3598_v22, %v1411_v29  ;;  %v3601_v27 = vadd.f32 %v3600_v24, %v3599_v23  ;;  %v3638_v11 = vadd.f32 %v3637_v28, %v3636_v26  ;;  %v3639_v32 = vpop.f32.mrb[30].mxu1 }
 0x132   :  { %v3640_v33 = vpop.f32.mrb[31].mxu1 }
 0x133   :  { %v1479_v30 = vadd.f32 %v3601_v27, %v1414_v31  ;;  %v1541_v34 = vadd.f32 %v3638_v11, %v1476_v25  ;;  %v3641_v35 = vadd.f32 %v3640_v33, %v3639_v32 }
 0x135   :  { %v1544_v13 = vadd.f32 %v3641_v35, %v1479_v30  ;;  %v3658_v36 = vpop.f32.mrb[32].mxu0 }
 0x136   :  { %v3659_v37 = vpop.f32.mrb[33].mxu0 }
 0x137   :  { %v3660_v38 = vadd.f32 %v3659_v37, %v3658_v36  ;;  %v3661_v39 = vpop.f32.mrb[34].mxu0  ;;  %v3698_v41 = vpop.f32.mrb[32].mxu1 }
 0x138   :  { %v3662_v42 = vpop.f32.mrb[35].mxu0  ;;  %v3699_v46 = vpop.f32.mrb[33].mxu1 }
 0x139   :  { %v1582_v43 = vadd.f32 %v3660_v38, %v1517_v47  ;;  %v3663_v44 = vadd.f32 %v3662_v42, %v3661_v39  ;;  %v3700_v29 = vadd.f32 %v3699_v46, %v3698_v41  ;;  %v3701_v48 = vpop.f32.mrb[34].mxu1 }
 0x13a   :  { %v3702_v51 = vpop.f32.mrb[35].mxu1 }
 0x13b   :  { %v1585_v50 = vadd.f32 %v3663_v44, %v1520_v49  ;;  %v3703_v31 = vadd.f32 %v3702_v51, %v3701_v48  ;;  %v1647_v52 = vadd.f32 %v3700_v29, %v1582_v43  ;;  %v4967_v51 = vld [vmem:[%s5589_s1 + $0x54] ss:$36 sps:$4 sm:$0xff]  }
 0x13d   :  { %v3664_v53 = vpop.f32.mrb[36].mxu0  ;;  %v1650_v57 = vadd.f32 %v3703_v31, %v1585_v50  ;;  %v4972_v31 = vld [vmem:[%s5589_s1 + $0x68] ss:$36 sps:$4 sm:$0xff]  }
 0x13e   :  { %v3665_v56 = vpop.f32.mrb[37].mxu0  ;;  %5626 = vst [vmem:[#allocation2_spill] sm:$0xff] %v4972_v31 }
 0x13f   :  { %v3666_v58 = vadd.f32 %v3665_v56, %v3664_v53  ;;  %v3667_v59 = vpop.f32.mrb[38].mxu0  ;;  %v3704_v60 = vpop.f32.mrb[36].mxu1 }
 0x140   :  { %v3668_v45 = vpop.f32.mrb[39].mxu0  ;;  %v3705_v63 = vpop.f32.mrb[37].mxu1 }
 0x141   :  { %v1590_v61 = vadd.f32 %v3666_v58, %v1525_v54  ;;  %v3669_v62 = vadd.f32 %v3668_v45, %v3667_v59  ;;  %v3706_v0 = vadd.f32 %v3705_v63, %v3704_v60  ;;  %v3707_v47 = vpop.f32.mrb[38].mxu1  ;;  %v4981_v58 = vld [vmem:[%s5589_s1 + $0x50] ss:$36 sps:$4 sm:$0xff]   ;;  %v4988_v45 = vld [vmem:[%s5589_s1 + $0x9c] ss:$36 sps:$4 sm:$0xff]  }
 0x142   :  { %v3708_v5 = vpop.f32.mrb[39].mxu1  ;;  %v5002_v63 = vld [vmem:[%s5589_s1 + $0x98] ss:$36 sps:$4 sm:$0xff]  }
 0x143   :  { %v1593_v4 = vadd.f32 %v3669_v62, %v1528_v3  ;;  %v3709_v6 = vadd.f32 %v3708_v5, %v3707_v47  ;;  %v1655_v7 = vadd.f32 %v3706_v0, %v1590_v61  ;;  %v5011_v47 = vld [vmem:[%s5589_s1 + $0xe4] ss:$36 sps:$4 sm:$0xff]  }
 0x145   :  { %v3670_v49 = vpop.f32.mrb[40].mxu0  ;;  %v1658_v9 = vadd.f32 %v3709_v6, %v1593_v4  ;;  %v5016_v4 = vld [vmem:[%s5589_s1 + $0xf8] ss:$36 sps:$4 sm:$0xff]  }
 0x146   :  { %v3671_v8 = vpop.f32.mrb[41].mxu0  ;;  %5628 = vst [vmem:[#allocation4_spill] sm:$0xff] %v5016_v4 }
 0x147   :  { %v3672_v10 = vadd.f32 %v3671_v8, %v3670_v49  ;;  %v3673_v12 = vpop.f32.mrb[42].mxu0  ;;  %v3710_v14 = vpop.f32.mrb[40].mxu1  ;;  %v5025_v8 = vld [vmem:[%s5589_s1 + $0xe0] ss:$36 sps:$4 sm:$0xff]  }
 0x148   :  { %v3674_v15 = vpop.f32.mrb[43].mxu0  ;;  %v3711_v17 = vpop.f32.mrb[41].mxu1 }
 0x149   :  { %v1598_v55 = vadd.f32 %v3672_v10, %v1533_v18  ;;  %v3675_v16 = vadd.f32 %v3674_v15, %v3673_v12  ;;  %v3712_v19 = vadd.f32 %v3711_v17, %v3710_v14  ;;  %v3713_v54 = vpop.f32.mrb[42].mxu1  ;;  %v5033_v12 = vld [vmem:[%s5589_s1 + $0x12c] ss:$36 sps:$4 sm:$0xff]   ;;  %v5038_v14 = vld [vmem:[%s5589_s1 + $0x140] ss:$36 sps:$4 sm:$0xff]  }
 0x14a   :  { %v3714_v21 = vpop.f32.mrb[43].mxu1  ;;  %5629 = vst [vmem:[#allocation5_spill] sm:$0xff] %v5038_v14 }
 0x14b   :  { %v1601_v20 = vadd.f32 %v3675_v16, %v1536_v2  ;;  %v3715_v22 = vadd.f32 %v3714_v21, %v3713_v54  ;;  %v1663_v23 = vadd.f32 %v3712_v19, %v1598_v55  ;;  %v5047_v16 = vld [vmem:[%s5589_s1 + $0x128] ss:$36 sps:$4 sm:$0xff]   ;;  %v5056_v19 = vld [vmem:[%s5589_s1 + $0x174] ss:$36 sps:$4 sm:$0xff]  }
 0x14c   :  { %v5061_v54 = vld [vmem:[%s5589_s1 + $0x188] ss:$36 sps:$4 sm:$0xff]  }
 0x14d   :  { %v3676_v3 = vpop.f32.mrb[44].mxu0  ;;  %v4951_v25 = vadd.f32 %v3715_v22, %v1601_v20  ;;  %5630 = vst [vmem:[#allocation6_spill] sm:$0xff] %v5061_v54 }
 0x14e   :  { %v3677_v24 = vpop.f32.mrb[45].mxu0 }
 0x14f   :  { %v3678_v26 = vadd.f32 %v3677_v24, %v3676_v3  ;;  %v3679_v27 = vpop.f32.mrb[46].mxu0  ;;  %v3716_v28 = vpop.f32.mrb[44].mxu1  ;;  %v5071_v3 = vld [vmem:[%s5589_s1 + $0x170] ss:$36 sps:$4 sm:$0xff]  }
 0x150   :  { %v3680_v30 = vpop.f32.mrb[47].mxu0  ;;  %v3717_v33 = vpop.f32.mrb[45].mxu1 }
 0x151   :  { %v1606_v11 = vadd.f32 %v3678_v26, %v1541_v34  ;;  %v3681_v32 = vadd.f32 %v3680_v30, %v3679_v27  ;;  %v3718_v18 = vadd.f32 %v3717_v33, %v3716_v28  ;;  %v3719_v35 = vpop.f32.mrb[46].mxu1  ;;  %v4960_v34 = vld [vmem:[%s5589_s1 + $0x8] ss:$36 sps:$4 sm:$0xff]   ;;  %v5079_v26 = vld [vmem:[%s5589_s1 + $0x1bc] ss:$36 sps:$4 sm:$0xff]  }
 0x152   :  { %v3720_v37 = vpop.f32.mrb[47].mxu1  ;;  %v5084_v27 = vld [vmem:[%s5589_s1 + $0x1d0] ss:$36 sps:$4 sm:$0xff]   ;;  %v5102_v33 = vld [vmem:[%s5589_s1 + $0x204] ss:$36 sps:$4 sm:$0xff]  }
 0x153   :  { %v1609_v36 = vadd.f32 %v3681_v32, %v1544_v13  ;;  %v3721_v38 = vadd.f32 %v3720_v37, %v3719_v35  ;;  %v4953_v2 = vadd.f32 %v3718_v18, %v1606_v11  ;;  %5631 = vst [vmem:[#allocation7_spill] sm:$0xff] %v5084_v27  ;;  %v5093_v11 = vld [vmem:[%s5589_s1 + $0x1b8] ss:$36 sps:$4 sm:$0xff]   ;;  %v5116_v35 = vld [vmem:[%s5589_s1 + $0x200] ss:$36 sps:$4 sm:$0xff]  }
 0x154   :  { %v5107_v18 = vld [vmem:[%s5589_s1 + $0x218] ss:$36 sps:$4 sm:$0xff]   ;;  %5633 = vst [vmem:[#allocation9_spill] sm:$0xff] %v5116_v35 }
 0x155   :  { %v4955_v39 = vadd.f32 %v3721_v38, %v1609_v36  ;;  %5632 = vst [vmem:[#allocation8_spill] sm:$0xff] %v5107_v18  ;;  %v5123_v36 = vld [vmem:[%s5589_s1 + $0x1c] ss:$36 sps:$4 sm:$0xff]   ;;  %v5138_v38 = vld [vmem:[%s5589_s1 + $0x64] ss:$36 sps:$4 sm:$0xff]  }
 0x156   :  { %5634 = vst [vmem:[#allocation10_spill] sm:$0xff] %v5123_v36  ;;  %v5132_v37 = vld [vmem:[%s5589_s1 + $0x18] ss:$36 sps:$4 sm:$0xff]   ;;  %5636 = vst [vmem:[#allocation12_spill] sm:$0xff] %v5138_v38 }
 0x157   :  { %5635 = vst [vmem:[#allocation11_spill] sm:$0xff] %v5132_v37 }
 0x165   :  { %v1711_v41 = vpop.f32.mrb[48].mxu0 }
 0x166   :  { %v1712_v42 = vadd.f32 %v1711_v41, %v1647_v52  ;;  %v1713_v43 = vpop.f32.mrb[49].mxu0  ;;  %v5160_v41 = vld [vmem:[%s5589_s1 + $0xa8] ss:$36 sps:$4 sm:$0xff]  }
 0x167   :  { %v1714_v44 = vpop.f32.mrb[50].mxu0  ;;  %5639 = vst [vmem:[#allocation15_spill] sm:$0xff] %v5160_v41  ;;  %v5174_v43 = vld [vmem:[%s5589_s1 + $0xf0] ss:$36 sps:$4 sm:$0xff]  }
 0x168   :  { %v1715_v46 = vadd.f32 %v1714_v44, %v1650_v57  ;;  %v1716_v29 = vpop.f32.mrb[51].mxu0  ;;  %v1742_v48 = vmax.f32 %v1712_v42, 0.0  ;;  %v5166_v42 = vld [vmem:[%s5589_s1 + $0xf4] ss:$36 sps:$4 sm:$0xff]   ;;  %5641 = vst [vmem:[#allocation17_spill] sm:$0xff] %v5174_v43 }
 0x169   :  { %5640 = vst [vmem:[#allocation16_spill] sm:$0xff] %v5166_v42  ;;  %v5181_v44 = vld [vmem:[%s5589_s1 + $0x13c] ss:$36 sps:$4 sm:$0xff]   ;;  %v5193_v29 = vld [vmem:[%s5589_s1 + $0x184] ss:$36 sps:$4 sm:$0xff]  }
 0x16a   :  { %v1743_v50 = vmax.f32 %v1715_v46, 0.0  ;;  %5642 = vst [vmem:[#allocation18_spill] sm:$0xff] %v5181_v44  ;;  %v5187_v46 = vld [vmem:[%s5589_s1 + $0x138] ss:$36 sps:$4 sm:$0xff]   ;;  %5644 = vst [vmem:[#allocation20_spill] sm:$0xff] %v5193_v29 }
 0x16b   :  { %5643 = vst [vmem:[#allocation19_spill] sm:$0xff] %v5187_v46 }
 0x16c   :  { %v4962_v13 = vpack.c.bf16 %v1743_v50, %v1742_v48  ;;  %v5200_v48 = vld [vmem:[%s5589_s1 + $0x180] ss:$36 sps:$4 sm:$0xff]   ;;  %v5207_v50 = vld [vmem:[%s5589_s1 + $0x1cc] ss:$36 sps:$4 sm:$0xff]  }
 0x16d   :  { %v1719_v52 = vpop.f32.mrb[52].mxu0  ;;  %5645 = vst [vmem:[#allocation21_spill] sm:$0xff] %v5200_v48  ;;  %5646 = vst [vmem:[#allocation22_spill] sm:$0xff] %v5207_v50 }
 0x16e   :  { %v1720_v53 = vadd.f32 %v1719_v52, %v1655_v7  ;;  %v1721_v56 = vpop.f32.mrb[53].mxu0  ;;  %2247 = vmatmul.mubr.bf16.vlgmr.msra.gmra.mrb[48].mxu1 %v4962_v13  ;;  %2393 = vmatmul.mubr.bf16.vlgmr.msra.gmra.mrb[64].mxu0 %v4962_v13  ;;  %v5213_v52 = vld [vmem:[%s5589_s1 + $0x1c8] ss:$36 sps:$4 sm:$0xff]  }
 0x16f   :  { %2288 = vmatpush1.bf16.msra.mxu1 %v4960_v34  ;;  %v1722_v57 = vpop.f32.mrb[54].mxu0  ;;  %3832 = vmatpush3.bf16.msra.mxu0 %v4948_v40  ;;  %v4993_v40 = vld [vmem:[%s5589_s1 + $0xb0] ss:$36 sps:$4 sm:$0xff]   ;;  %5647 = vst [vmem:[#allocation23_spill] sm:$0xff] %v5213_v52 }
 0x170   :  { %v1723_v59 = vadd.f32 %v1722_v57, %v1658_v9  ;;  %v1724_v60 = vpop.f32.mrb[55].mxu0  ;;  %2289 = vmatprep.subr.bf16.mxu1 %v4967_v51  ;;  %3833 = vmatprep.subr.bf16.mxu0 %v4972_v31  ;;  %5627 = vst [vmem:[#allocation3_spill] sm:$0xff] %v4993_v40  ;;  %v1744_v61 = vmax.f32 %v1720_v53, 0.0  ;;  %v5219_v53 = vld [vmem:[%s5589_s1 + $0x214] ss:$36 sps:$4 sm:$0xff]  }
 0x171   :  { %2256 = vmatprep.mubr.bf16.mxu1 %v5593_v1  ;;  %2402 = vmatprep.mubr.bf16.mxu0 %v5593_v1  ;;  %5648 = vst [vmem:[#allocation24_spill] sm:$0xff] %v5219_v53  ;;  %v5226_v56 = vld [vmem:[%s5589_s1 + $0x210] ss:$36 sps:$4 sm:$0xff]   ;;  %v4198_v57 = vld [vmem:[%s5590_s3 + $0x4] ss:$20 sps:$4 sm:$0xff]  }
 0x172   :  { %v1745_v62 = vmax.f32 %v1723_v59, 0.0  ;;  %5649 = vst [vmem:[#allocation25_spill] sm:$0xff] %v5226_v56 }
 0x173   :  { %2290 = vmatpush1.bf16.msra.mxu1 %v4981_v58  ;;  %3834 = vmatpush3.bf16.msra.mxu0 %v4972_v31 }
 0x174   :  { %v5004_v0 = vpack.c.bf16 %v1745_v62, %v1744_v61  ;;  %2291 = vmatprep.subr.bf16.mxu1 %v4988_v45  ;;  %3835 = vmatprep.subr.bf16.mxu0 %v4993_v40 }
 0x175   :  { %v1727_v5 = vpop.f32.mrb[56].mxu0 }
 0x176   :  { %v1728_v6 = vadd.f32 %v1727_v5, %v1663_v23  ;;  %v1729_v7 = vpop.f32.mrb[57].mxu0  ;;  %2257 = vmatmul.mubr.bf16.gmra.mrb[52].mxu1 %v5004_v0  ;;  %2403 = vmatmul.mubr.bf16.gmra.mrb[68].mxu0 %v5004_v0 }
 0x177   :  { %2292 = vmatpush1.bf16.msra.mxu1 %v5002_v63  ;;  %v1730_v49 = vpop.f32.mrb[58].mxu0  ;;  %3836 = vmatpush3.bf16.msra.mxu0 %v4993_v40 }
 0x178   :  { %v1731_v9 = vadd.f32 %v1730_v49, %v4951_v25  ;;  %v1732_v10 = vpop.f32.mrb[59].mxu0  ;;  %2293 = vmatprep.subr.bf16.mxu1 %v5011_v47  ;;  %3837 = vmatprep.subr.bf16.mxu0 %v5016_v4  ;;  %v1746_v15 = vmax.f32 %v1728_v6, 0.0 }
 0x179   :  { %2266 = vmatprep.mubr.bf16.mxu1 %v5593_v1  ;;  %2412 = vmatprep.mubr.bf16.mxu0 %v5593_v1 }
 0x17a   :  { %v1747_v55 = vmax.f32 %v1731_v9, 0.0 }
 0x17b   :  { %2294 = vmatpush1.bf16.msra.mxu1 %v5025_v8  ;;  %3838 = vmatpush3.bf16.msra.mxu0 %v5016_v4 }
 0x17c   :  { %v5049_v17 = vpack.c.bf16 %v1747_v55, %v1746_v15  ;;  %2295 = vmatprep.subr.bf16.mxu1 %v5033_v12  ;;  %3839 = vmatprep.subr.bf16.mxu0 %v5038_v14 }
 0x17d   :  { %v1735_v20 = vpop.f32.mrb[60].mxu0 }
 0x17e   :  { %v1736_v21 = vadd.f32 %v1735_v20, %v4953_v2  ;;  %v1737_v22 = vpop.f32.mrb[61].mxu0  ;;  %2267 = vmatmul.mubr.bf16.gmra.mrb[56].mxu1 %v5049_v17  ;;  %2413 = vmatmul.mubr.bf16.gmra.mrb[72].mxu0 %v5049_v17  ;;  %v5147_v2 = vld [vmem:[%s5589_s1 + $0x60] ss:$36 sps:$4 sm:$0xff]  }
 0x17f   :  { %2296 = vmatpush1.bf16.msra.mxu1 %v5047_v16  ;;  %v1738_v23 = vpop.f32.mrb[62].mxu0  ;;  %3840 = vmatpush3.bf16.msra.mxu0 %v5038_v14  ;;  %5637 = vst [vmem:[#allocation13_spill] sm:$0xff] %v5147_v2 }
 0x180   :  { %v1739_v24 = vadd.f32 %v1738_v23, %v4955_v39  ;;  %v1740_v25 = vpop.f32.mrb[63].mxu0  ;;  %2297 = vmatprep.subr.bf16.mxu1 %v5056_v19  ;;  %3841 = vmatprep.subr.bf16.mxu0 %v5061_v54  ;;  %v1748_v28 = vmax.f32 %v1736_v21, 0.0  ;;  %v5154_v39 = vld [vmem:[%s5589_s1 + $0xac] ss:$36 sps:$4 sm:$0xff]  }
 0x181   :  { %2276 = vmatprep.mubr.bf16.mxu1 %v5593_v1  ;;  %2422 = vmatprep.mubr.bf16.mxu0 %v5593_v1  ;;  %5638 = vst [vmem:[#allocation14_spill] sm:$0xff] %v5154_v39 }
 0x182   :  { %v1749_v30 = vmax.f32 %v1739_v24, 0.0 }
 0x183   :  { %2298 = vmatpush1.bf16.msra.mxu1 %v5071_v3  ;;  %3842 = vmatpush3.bf16.msra.mxu0 %v5061_v54 }
 0x184   :  { %v5095_v32 = vpack.c.bf16 %v1749_v30, %v1748_v28  ;;  %2299 = vmatprep.subr.bf16.mxu1 %v5079_v26  ;;  %3843 = vmatprep.subr.bf16.mxu0 %v5084_v27 }
 0x186   :  { %2277 = vmatmul.mubr.bf16.gmra.mrb[60].mxu1 %v5095_v32  ;;  %2423 = vmatmul.mubr.bf16.gmra.mrb[76].mxu0 %v5095_v32 }
 0x187   :  { %2300 = vmatpush1.bf16.msra.mxu1 %v5093_v11  ;;  %3844 = vmatpush3.bf16.msra.mxu0 %v5084_v27 }
 0x188   :  { %3847 = vmatprep.mubr.bf16.mxu0 %v4962_v13  ;;  %2301 = vmatprep.subr.bf16.mxu1 %v5102_v33 }
 0x189   :  { %3845 = vmatprep.subr.bf16.mxu0 %v5107_v18  ;;  %2319 = vmatprep.mubr.bf16.mxu1 %v5593_v1 }
 0x18b   :  { %2302 = vmatpush1.bf16.msra.mxu1 %v5116_v35  ;;  %3846 = vmatpush3.bf16.msra.mxu0 %v5107_v18 }
 0x18c   :  { %2433 = vmatprep.subr.bf16.mxu1 %v5123_v36 }
 0x18e   :  { %2320 = vmatmul.mubr.bf16.vlgmr.msra.gmra.mrb[64].mxu1 %v4962_v13  ;;  %3848 = vmatmul.mubr.bf16.vlgmr.msra.gmra.mrb[80].mxu0 %v5004_v0 }
 0x18f   :  { %2434 = vmatpush1.bf16.msra.mxu1 %v5132_v37  ;;  %3851 = vmatprep.mubr.bf16.mxu0 %v5049_v17 }
 0x190   :  { %2435 = vmatprep.subr.bf16.mxu1 %v5138_v38  ;;  %2329 = vmatprep.mubr.bf16.mxu1 %v5593_v1 }
 0x193   :  { %2436 = vmatpush1.bf16.msra.mxu1 %v5147_v2 }
 0x194   :  { %2437 = vmatprep.subr.bf16.mxu1 %v5154_v39 }
 0x196   :  { %2330 = vmatmul.mubr.bf16.gmra.mrb[68].mxu1 %v5004_v0  ;;  %3852 = vmatmul.mubr.bf16.gmra.mrb[84].mxu0 %v5095_v32 }
 0x197   :  { %2438 = vmatpush1.bf16.msra.mxu1 %v5160_v41  ;;  %2339 = vmatprep.mubr.bf16.mxu1 %v5593_v1 }
 0x198   :  { %2439 = vmatprep.subr.bf16.mxu1 %v5166_v42 }
 0x19b   :  { %2440 = vmatpush1.bf16.msra.mxu1 %v5174_v43 }
 0x19c   :  { %2441 = vmatprep.subr.bf16.mxu1 %v5181_v44 }
 0x19e   :  { %2340 = vmatmul.mubr.bf16.gmra.mrb[72].mxu1 %v5049_v17 }
 0x19f   :  { %2442 = vmatpush1.bf16.msra.mxu1 %v5187_v46  ;;  %2349 = vmatprep.mubr.bf16.mxu1 %v5593_v1 }
 0x1a0   :  { %2443 = vmatprep.subr.bf16.mxu1 %v5193_v29 }
 0x1a3   :  { %2444 = vmatpush1.bf16.msra.mxu1 %v5200_v48 }
 0x1a4   :  { %2445 = vmatprep.subr.bf16.mxu1 %v5207_v50 }
 0x1a6   :  { %2350 = vmatmul.mubr.bf16.gmra.mrb[76].mxu1 %v5095_v32 }
 0x1a7   :  { %2446 = vmatpush1.bf16.msra.mxu1 %v5213_v52  ;;  %2465 = vmatprep.mubr.bf16.mxu1 %v5593_v1 }
 0x1a8   :  { %2447 = vmatprep.subr.bf16.mxu1 %v5219_v53 }
 0x1ab   :  { %2448 = vmatpush1.bf16.msra.mxu1 %v5226_v56 }
 0x1ae   :  { %2466 = vmatmul.mubr.bf16.vlgmr.msra.gmra.mrb[80].mxu1 %v4962_v13  ;;  %v4204_v13 = vld [vmem:[%s5590_s3 + $0xc] ss:$20 sps:$4 sm:$0xff]  }
 0x1af   :  { %2475 = vmatprep.mubr.bf16.mxu1 %v5593_v1  ;;  %2768 = vmatprep.mubr.bf16.mxu0 %v4204_v13 }
 0x1b6   :  { %2476 = vmatmul.mubr.bf16.gmra.mrb[84].mxu1 %v5004_v0 }
 0x1b7   :  { %2485 = vmatprep.mubr.bf16.mxu1 %v5593_v1 }
 0x1be   :  { %2486 = vmatmul.mubr.bf16.gmra.mrb[88].mxu1 %v5049_v17 }
 0x1bf   :  { %2495 = vmatprep.mubr.bf16.mxu1 %v5593_v1 }
 0x1c6   :  { %2496 = vmatmul.mubr.bf16.gmra.mrb[92].mxu1 %v5095_v32 }
 0x1c7   :  { %2719 = vmatprep.mubr.bf16.mxu1 %v4198_v57 }
 0x241   :  { %v2248_v59 = vpop.f32.mrb[48].mxu1  ;;  %v5244_v60 = vpop.f32.mrb[64].mxu0 }
 0x242   :  { %v5246_v61 = vpop.f32.mrb[49].mxu1  ;;  %v5248_v62 = vpop.f32.mrb[65].mxu0 }
 0x243   :  { %v2252_v0 = vpop.f32.mrb[50].mxu1  ;;  %v5250_v5 = vpop.f32.mrb[66].mxu0 }
 0x244   :  { %v2571_v6 = vpack.c.bf16 %v2252_v0, %v2248_v59  ;;  %v5254_v49 = vpop.f32.mrb[51].mxu1  ;;  %v5256_v9 = vpop.f32.mrb[67].mxu0 }
 0x249   :  { %v5262_v55 = vpop.f32.mrb[52].mxu1  ;;  %v5264_v17 = vpop.f32.mrb[68].mxu0 }
 0x24a   :  { %v5266_v20 = vpop.f32.mrb[53].mxu1  ;;  %v5268_v21 = vpop.f32.mrb[69].mxu0 }
 0x24b   :  { %v2262_v22 = vpop.f32.mrb[54].mxu1  ;;  %v5270_v23 = vpop.f32.mrb[70].mxu0 }
 0x24c   :  { %v2580_v24 = vpack.c.bf16 %v2262_v22, %v5262_v55  ;;  %v5275_v28 = vpop.f32.mrb[55].mxu1  ;;  %v5277_v30 = vpop.f32.mrb[71].mxu0 }
 0x251   :  { %v2268_v13 = vpop.f32.mrb[56].mxu1  ;;  %v5283_v59 = vpop.f32.mrb[72].mxu0 }
 0x252   :  { %v5285_v0 = vpop.f32.mrb[57].mxu1  ;;  %v5287_v1 = vpop.f32.mrb[73].mxu0 }
 0x253   :  { %v2272_v55 = vpop.f32.mrb[58].mxu1  ;;  %v5289_v22 = vpop.f32.mrb[74].mxu0 }
 0x254   :  { %v2589_v15 = vpack.c.bf16 %v2272_v55, %v2268_v13  ;;  %v5293_v7 = vpop.f32.mrb[59].mxu1  ;;  %v5295_v32 = vpop.f32.mrb[75].mxu0 }
 0x259   :  { %v2278_v18 = vpop.f32.mrb[60].mxu1  ;;  %v5301_v27 = vpop.f32.mrb[76].mxu0 }
 0x25a   :  { %v5303_v54 = vpop.f32.mrb[61].mxu1  ;;  %v5305_v14 = vpop.f32.mrb[77].mxu0 }
 0x25b   :  { %v2282_v13 = vpop.f32.mrb[62].mxu1  ;;  %v5307_v55 = vpop.f32.mrb[78].mxu0 }
 0x25c   :  { %v2598_v25 = vpack.c.bf16 %v2282_v13, %v2278_v18  ;;  %v5311_v40 = vpop.f32.mrb[63].mxu1  ;;  %v5313_v57 = vpop.f32.mrb[79].mxu0 }
 0x261   :  { %v2321_v56 = vpop.f32.mrb[64].mxu1  ;;  %v3849_v53 = vpop.f32.mrb[80].mxu0 }
 0x262   :  { %v2323_v52 = vpop.f32.mrb[65].mxu1  ;;  %v2540_v50 = vpop.f32.mrb[81].mxu0 }
 0x263   :  { %v2325_v48 = vpop.f32.mrb[66].mxu1  ;;  %v3850_v29 = vpop.f32.mrb[82].mxu0 }
 0x264   :  { %v2573_v18 = vpack.c.bf16 %v2325_v48, %v2321_v56  ;;  %v5319_v13 = vpack.c.bf16 %v3850_v29, %v3849_v53  ;;  %v2327_v4 = vpop.f32.mrb[67].mxu1  ;;  %v2543_v46 = vpop.f32.mrb[83].mxu0 }
 0x265   :  { %v2574_v44 = vpack.c.bf16 %v2327_v4, %v2323_v52  ;;  %v5321_v43 = vpack.c.bf16 %v2543_v46, %v2540_v50 }
 0x266   :  { %3734 = vmatprep.subr.bf16.mxu1 %v2573_v18 }
 0x267   :  { %3735 = vmatpush3.bf16.msra.mxu1 %v2571_v6 }
 0x269   :  { %v2331_v10 = vpop.f32.mrb[68].mxu1  ;;  %v3853_v42 = vpop.f32.mrb[84].mxu0 }
 0x26a   :  { %v2333_v41 = vpop.f32.mrb[69].mxu1  ;;  %v2556_v31 = vpop.f32.mrb[85].mxu0 }
 0x26b   :  { %v2335_v39 = vpop.f32.mrb[70].mxu1  ;;  %v3854_v2 = vpop.f32.mrb[86].mxu0 }
 0x26c   :  { %v2582_v38 = vpack.c.bf16 %v2335_v39, %v2331_v10  ;;  %v5323_v37 = vpack.c.bf16 %v3854_v2, %v3853_v42  ;;  %v2337_v36 = vpop.f32.mrb[71].mxu1  ;;  %v2559_v48 = vpop.f32.mrb[87].mxu0 }
 0x26d   :  { %v2583_v29 = vpack.c.bf16 %v2337_v36, %v2333_v41  ;;  %v5325_v53 = vpack.c.bf16 %v2559_v48, %v2556_v31  ;;  %v5650_v41 = vpack.c.bf16 %v5254_v49, %v5246_v61  ;;  %v5653_v61 = vpack.c.bf16 %v5293_v7, %v5285_v0  ;;  %v4199_v7 = vld [vmem:[%s5590_s3 + $0x2c] ss:$20 sps:$4 sm:$0xff]  }
 0x26e   :  { %3736 = vmatprep.subr.bf16.mxu1 %v2582_v38 }
 0x26f   :  { %3737 = vmatpush3.bf16.msra.mxu1 %v2580_v24 }
 0x271   :  { %v2341_v4 = vpop.f32.mrb[72].mxu1 }
 0x272   :  { %v2343_v46 = vpop.f32.mrb[73].mxu1 }
 0x273   :  { %v2345_v50 = vpop.f32.mrb[74].mxu1 }
 0x274   :  { %v2591_v52 = vpack.c.bf16 %v2345_v50, %v2341_v4  ;;  %v2347_v56 = vpop.f32.mrb[75].mxu1  ;;  %v5651_v4 = vpack.c.bf16 %v5275_v28, %v5266_v20  ;;  %v4196_v20 = vld [vmem:[%s5590_s3] ss:$20 sps:$4 sm:$0xff]  }
 0x275   :  { %v2592_v6 = vpack.c.bf16 %v2347_v56, %v2343_v46 }
 0x276   :  { %3738 = vmatprep.subr.bf16.mxu1 %v2591_v52 }
 0x277   :  { %3739 = vmatpush3.bf16.msra.mxu1 %v2589_v15 }
 0x279   :  { %v2351_v18 = vpop.f32.mrb[76].mxu1 }
 0x27a   :  { %v2353_v35 = vpop.f32.mrb[77].mxu1 }
 0x27b   :  { %v2355_v39 = vpop.f32.mrb[78].mxu1 }
 0x27c   :  { %v2600_v2 = vpack.c.bf16 %v2355_v39, %v2351_v18  ;;  %v2357_v42 = vpop.f32.mrb[79].mxu1 }
 0x27d   :  { %v2601_v10 = vpack.c.bf16 %v2357_v42, %v2353_v35  ;;  %v5652_v35 = vpack.c.bf16 %v5250_v5, %v5244_v60  ;;  %v5654_v60 = vpack.c.bf16 %v5311_v40, %v5303_v54  ;;  %v5655_v5 = vpack.c.bf16 %v5270_v23, %v5264_v17  ;;  %v4201_v17 = vld [vmem:[%s5590_s3 + $0x28] ss:$20 sps:$4 sm:$0xff]  }
 0x27e   :  { %3740 = vmatprep.subr.bf16.mxu1 %v2600_v2  ;;  %v5656_v23 = vpack.c.bf16 %v5289_v22, %v5283_v59  ;;  %v4206_v22 = vld [vmem:[%s5590_s3 + $0x38] ss:$20 sps:$4 sm:$0xff]  }
 0x27f   :  { %3741 = vmatpush3.bf16.msra.mxu1 %v2598_v25 }
 0x280   :  { %3742 = vmatprep.subr.bf16.mxu1 %v2574_v44 }
 0x281   :  { %v2467_v31 = vpop.f32.mrb[80].mxu1 }
 0x282   :  { %v2469_v36 = vpop.f32.mrb[81].mxu1 }
 0x283   :  { %v2471_v38 = vpop.f32.mrb[82].mxu1  ;;  %3743 = vmatpush3.bf16.msra.mxu1 %v5650_v41 }
 0x284   :  { %v2577_v24 = vpack.c.bf16 %v2471_v38, %v2467_v31  ;;  %v2473_v48 = vpop.f32.mrb[83].mxu1  ;;  %3744 = vmatprep.subr.bf16.mxu1 %v2583_v29  ;;  %v4230_v31 = vld [vmem:[%s5589_s1 + $0x14] ss:$36 sps:$4 sm:$0xff]  }
 0x285   :  { %v2578_v15 = vpack.c.bf16 %v2473_v48, %v2469_v36 }
 0x286   :  { %3762 = vmatprep.subr.bf16.mxu0 %v2577_v24 }
 0x287   :  { %3745 = vmatpush3.bf16.msra.mxu1 %v5651_v4  ;;  %3763 = vmatpush3.bf16.msra.mxu0 %v5652_v35 }
 0x288   :  { %3746 = vmatprep.subr.bf16.mxu1 %v2592_v6 }
 0x289   :  { %v2477_v44 = vpop.f32.mrb[84].mxu1 }
 0x28a   :  { %v2479_v25 = vpop.f32.mrb[85].mxu1 }
 0x28b   :  { %v2481_v46 = vpop.f32.mrb[86].mxu1  ;;  %3747 = vmatpush3.bf16.msra.mxu1 %v5653_v61 }
 0x28c   :  { %v2586_v49 = vpack.c.bf16 %v2481_v46, %v2477_v44  ;;  %v2483_v29 = vpop.f32.mrb[87].mxu1  ;;  %3748 = vmatprep.subr.bf16.mxu1 %v2601_v10  ;;  %v5658_v10 = vpack.c.bf16 %v5256_v9, %v5248_v62  ;;  %v5661_v62 = vpack.c.bf16 %v5295_v32, %v5287_v1  ;;  %v4214_v1 = vld [vmem:[%s5589_s1 + $0x4] ss:$36 sps:$4 sm:$0xff]   ;;  %v4227_v32 = vld [vmem:[%s5589_s1 + $0x1b0] ss:$36 sps:$4 sm:$0xff]  }
 0x28d   :  { %v2587_v50 = vpack.c.bf16 %v2483_v29, %v2479_v25  ;;  %v5664_v9 = vld [vmem:[#allocation10_spill] sm:$0xff] }
 0x28e   :  { %3764 = vmatprep.subr.bf16.mxu0 %v2586_v49 }
 0x28f   :  { %3749 = vmatpush3.bf16.msra.mxu1 %v5654_v60  ;;  %3765 = vmatpush3.bf16.msra.mxu0 %v5655_v5  ;;  %v2614_v5 = vpop.permute.xlu0 %2613 }
 0x290   :  { %3855 = vmatprep.subr.bf16.mxu1 %v5321_v43 }
 0x291   :  { %v2487_v28 = vpop.f32.mrb[88].mxu1 }
 0x292   :  { %v2489_v0 = vpop.f32.mrb[89].mxu1  ;;  %2720 = vmatmul.mubr.bf16.vlgmr.msra.gmra.mrb[96].mxu1 %v4196_v20 }
 0x293   :  { %v2491_v52 = vpop.f32.mrb[90].mxu1  ;;  %3856 = vmatpush3.bf16.msra.mxu1 %v5321_v43  ;;  %2727 = vmatprep.mubr.bf16.mxu1 %v4199_v7  ;;  %v4205_v43 = vld [vmem:[%s5590_s3 + $0x10] ss:$20 sps:$4 sm:$0xff]  }
 0x294   :  { %v2595_v56 = vpack.c.bf16 %v2491_v52, %v2487_v28  ;;  %v2493_v40 = vpop.f32.mrb[91].mxu1  ;;  %3857 = vmatprep.subr.bf16.mxu1 %v5319_v13 }
 0x295   :  { %v2596_v54 = vpack.c.bf16 %v2493_v40, %v2489_v0 }
 0x296   :  { %3766 = vmatprep.subr.bf16.mxu0 %v2595_v56  ;;  %v2619_v56 = vpop.permute.xlu1 %2618 }
 0x297   :  { %3767 = vmatpush3.bf16.msra.mxu0 %v5656_v23  ;;  %3858 = vmatpush3.bf16.msra.mxu1 %v5319_v13  ;;  %v5657_v13 = vpack.c.bf16 %v5307_v55, %v5301_v27  ;;  %v5659_v27 = vmov 0   ;;  %v4229_v55 = vld [vmem:[%s5589_s1 + $0x1f8] ss:$36 sps:$4 sm:$0xff]  }
 0x298   :  { %3859 = vmatprep.subr.bf16.mxu1 %v5325_v53 }
 0x299   :  { %v2497_v6 = vpop.f32.mrb[92].mxu1 }
 0x29a   :  { %v2499_v18 = vpop.f32.mrb[93].mxu1  ;;  %2728 = vmatmul.mubr.bf16.gmra.mrb[100].mxu1 %v4201_v17 }
 0x29b   :  { %v2501_v39 = vpop.f32.mrb[94].mxu1  ;;  %3860 = vmatpush3.bf16.msra.mxu1 %v5325_v53  ;;  %3863 = vmatprep.mubr.msk.bf16.mxu1 %vm1274_vm0, %v4205_v43  ;;  %v4213_v53 = vld [vmem:[%s5589_s1 + $0xc] ss:$36 sps:$4 sm:$0xff]  }
 0x29c   :  { %v2604_v2 = vpack.c.bf16 %v2501_v39, %v2497_v6  ;;  %v2503_v42 = vpop.f32.mrb[95].mxu1  ;;  %3861 = vmatprep.subr.bf16.mxu1 %v5323_v37 }
 0x29d   :  { %v2605_v59 = vpack.c.bf16 %v2503_v42, %v2499_v18 }
 0x29e   :  { %3768 = vmatprep.subr.bf16.mxu0 %v2604_v2  ;;  %v2624_v2 = vpop.permute.xlu0 %2623 }
 0x29f   :  { %3769 = vmatpush3.bf16.msra.mxu0 %v5657_v13  ;;  %3862 = vmatpush3.bf16.msra.mxu1 %v5323_v37  ;;  %v5660_v37 = vpack.c.bf16 %v5277_v30, %v5268_v21  ;;  %v4225_v21 = vld [vmem:[%s5589_s1 + $0x168] ss:$36 sps:$4 sm:$0xff]   ;;  %v4226_v30 = vld [vmem:[%s5589_s1 + $0x1b4] ss:$36 sps:$4 sm:$0xff]  }
 0x2a0   :  { %3770 = vmatprep.subr.bf16.mxu0 %v2578_v15  ;;  %2895 = vmatprep.subr.bf16.mxu1 %v4213_v53 }
 0x2a2   :  { %3864 = vmatmul.mubr.msk.bf16.vlgmr.msra.gmra.mrb[104].mxu1 %vm1274_vm0, %v4206_v22 }
 0x2a3   :  { %3771 = vmatpush3.bf16.msra.mxu0 %v5658_v10  ;;  %2896 = vmatpush1.bf16.msra.mxu1 %v4960_v34  ;;  %v4202_v34 = vld [vmem:[%s5590_s3 + $0x8] ss:$20 sps:$4 sm:$0xff]  }
 0x2a4   :  { %3772 = vmatprep.subr.bf16.mxu0 %v2587_v50  ;;  %2897 = vmatprep.subr.bf16.mxu1 %v4967_v51  ;;  %v5662_v51 = vpack.c.bf16 %v5313_v57, %v5305_v14  ;;  %v4219_v14 = vld [vmem:[%s5589_s1 + $0x90] ss:$36 sps:$4 sm:$0xff]   ;;  %v4228_v57 = vld [vmem:[%s5589_s1 + $0x1fc] ss:$36 sps:$4 sm:$0xff]  }
 0x2a5   :  { %2927 = vmatprep.mubr.bf16.mxu1 %v5659_v27 }
 0x2a7   :  { %3773 = vmatpush3.bf16.msra.mxu0 %v5660_v37  ;;  %2898 = vmatpush1.bf16.msra.mxu1 %v4981_v58  ;;  %v4207_v58 = vld [vmem:[%s5590_s3 + $0x34] ss:$20 sps:$4 sm:$0xff]   ;;  %v2629_v37 = vpop.permute.xlu1 %2628 }
 0x2a8   :  { %3774 = vmatprep.subr.bf16.mxu0 %v2596_v54  ;;  %2899 = vmatprep.subr.bf16.mxu1 %v4988_v45  ;;  %v4215_v45 = vld [vmem:[%s5589_s1] ss:$36 sps:$4 sm:$0xff]  }
 0x2ab   :  { %3775 = vmatpush3.bf16.msra.mxu0 %v5661_v62  ;;  %2900 = vmatpush1.bf16.msra.mxu1 %v5002_v63  ;;  %v4216_v63 = vld [vmem:[%s5589_s1 + $0x4c] ss:$36 sps:$4 sm:$0xff]  }
 0x2ac   :  { %3776 = vmatprep.subr.bf16.mxu0 %v2605_v59  ;;  %2901 = vmatprep.subr.bf16.mxu1 %v5011_v47  ;;  %v4209_v47 = vld [vmem:[%s5590_s3 + $0x30] ss:$20 sps:$4 sm:$0xff]  }
 0x2af   :  { %3777 = vmatpush3.bf16.msra.mxu0 %v5662_v51  ;;  %2902 = vmatpush1.bf16.msra.mxu1 %v5025_v8  ;;  %v4217_v8 = vld [vmem:[%s5589_s1 + $0x48] ss:$36 sps:$4 sm:$0xff]  }
 0x2b0   :  { %2842 = vmatprep.subr.bf16.mxu0 %v4214_v1  ;;  %2903 = vmatprep.subr.bf16.mxu1 %v5033_v12  ;;  %v4218_v12 = vld [vmem:[%s5589_s1 + $0x94] ss:$36 sps:$4 sm:$0xff]  }
 0x2b2   :  { %2769 = vmatmul.mubr.bf16.vlgmr.msra.gmra.mrb[88].mxu0 %v4202_v34 }
 0x2b3   :  { %2776 = vmatprep.mubr.bf16.mxu0 %v4207_v58  ;;  %2843 = vmatpush1.bf16.msra.mxu0 %v4215_v45 }
 0x2b4   :  { %2844 = vmatprep.subr.bf16.mxu0 %v4216_v63  ;;  %2904 = vmatpush1.bf16.msra.mxu1 %v5047_v16  ;;  %v4220_v16 = vld [vmem:[%s5589_s1 + $0xdc] ss:$36 sps:$4 sm:$0xff]  }
 0x2b5   :  { %2905 = vmatprep.subr.bf16.mxu1 %v5056_v19  ;;  %v4221_v19 = vld [vmem:[%s5589_s1 + $0xd8] ss:$36 sps:$4 sm:$0xff]  }
 0x2b7   :  { %2845 = vmatpush1.bf16.msra.mxu0 %v4217_v8  ;;  %v5665_v8 = vld [vmem:[#allocation11_spill] sm:$0xff] }
 0x2b8   :  { %2846 = vmatprep.subr.bf16.mxu0 %v4218_v12  ;;  %2906 = vmatpush1.bf16.msra.mxu1 %v5071_v3  ;;  %v4222_v3 = vld [vmem:[%s5589_s1 + $0x124] ss:$36 sps:$4 sm:$0xff]  }
 0x2b9   :  { %2907 = vmatprep.subr.bf16.mxu1 %v5079_v26  ;;  %v5663_v26 = vld [vmem:[#allocation9_spill] sm:$0xff] }
 0x2ba   :  { %2777 = vmatmul.mubr.bf16.gmra.mrb[92].mxu0 %v4209_v47  ;;  %v4231_v47 = vld [vmem:[%s5589_s1 + $0x10] ss:$36 sps:$4 sm:$0xff]  }
 0x2bb   :  { %2847 = vmatpush1.bf16.msra.mxu0 %v4219_v14  ;;  %2874 = vmatprep.mubr.bf16.mxu0 %v5659_v27  ;;  %v4232_v14 = vld [vmem:[%s5589_s1 + $0x5c] ss:$36 sps:$4 sm:$0xff]  }
 0x2bc   :  { %2848 = vmatprep.subr.bf16.mxu0 %v4220_v16  ;;  %2908 = vmatpush1.bf16.msra.mxu1 %v5093_v11  ;;  %v4223_v11 = vld [vmem:[%s5589_s1 + $0x120] ss:$36 sps:$4 sm:$0xff]   ;;  %v5666_v16 = vld [vmem:[#allocation12_spill] sm:$0xff] }
 0x2bd   :  { %2909 = vmatprep.subr.bf16.mxu1 %v5102_v33  ;;  %v4224_v33 = vld [vmem:[%s5589_s1 + $0x16c] ss:$36 sps:$4 sm:$0xff]  }
 0x2bf   :  { %2849 = vmatpush1.bf16.msra.mxu0 %v4221_v19 }
 0x2c0   :  { %2850 = vmatprep.subr.bf16.mxu0 %v4222_v3  ;;  %2910 = vmatpush1.bf16.msra.mxu1 %v5663_v26  ;;  %v4233_v26 = vld [vmem:[%s5589_s1 + $0x58] ss:$36 sps:$4 sm:$0xff]  }
 0x2c1   :  { %3001 = vmatprep.subr.bf16.mxu1 %v5664_v9  ;;  %v5667_v9 = vld [vmem:[#allocation13_spill] sm:$0xff] }
 0x2c3   :  { %2851 = vmatpush1.bf16.msra.mxu0 %v4223_v11 }
 0x2c4   :  { %2852 = vmatprep.subr.bf16.mxu0 %v4224_v33  ;;  %v4234_v33 = vld [vmem:[%s5589_s1 + $0xa4] ss:$36 sps:$4 sm:$0xff]  }
 0x2c7   :  { %2853 = vmatpush1.bf16.msra.mxu0 %v4225_v21  ;;  %v5668_v21 = vld [vmem:[#allocation14_spill] sm:$0xff] }
 0x2c8   :  { %2854 = vmatprep.subr.bf16.mxu0 %v4226_v30  ;;  %v4235_v30 = vld [vmem:[%s5589_s1 + $0xa0] ss:$36 sps:$4 sm:$0xff]  }
 0x2cb   :  { %2855 = vmatpush1.bf16.msra.mxu0 %v4227_v32  ;;  %v5669_v32 = vld [vmem:[#allocation15_spill] sm:$0xff] }
 0x2cc   :  { %2856 = vmatprep.subr.bf16.mxu0 %v4228_v57  ;;  %v4236_v57 = vld [vmem:[%s5589_s1 + $0xec] ss:$36 sps:$4 sm:$0xff]  }
 0x2cf   :  { %2857 = vmatpush1.bf16.msra.mxu0 %v4229_v55  ;;  %v5670_v55 = vld [vmem:[#allocation16_spill] sm:$0xff] }
 0x2d0   :  { %2948 = vmatprep.subr.bf16.mxu0 %v4230_v31  ;;  %v4237_v31 = vld [vmem:[%s5589_s1 + $0xe8] ss:$36 sps:$4 sm:$0xff]  }
 0x365   :  { %v3750_v36 = vpop.f32.mrb[96].mxu1 }
 0x366   :  { %v3751_v38 = vpop.f32.mrb[97].mxu1 }
 0x367   :  { %v3752_v41 = vadd.f32 %v3751_v38, %v3750_v36  ;;  %v3753_v24 = vpop.f32.mrb[98].mxu1  ;;  %v5671_v36 = vld [vmem:[#allocation17_spill] sm:$0xff] }
 0x368   :  { %v3754_v48 = vpop.f32.mrb[99].mxu1  ;;  %v4238_v38 = vld [vmem:[%s5589_s1 + $0x134] ss:$36 sps:$4 sm:$0xff]  }
 0x369   :  { %v3755_v15 = vadd.f32 %v3754_v48, %v3753_v24  ;;  %v2722_v28 = vadd.f32 %v3752_v41, %v2614_v5  ;;  %v5672_v41 = vld [vmem:[#allocation18_spill] sm:$0xff]  ;;  %v4239_v24 = vld [vmem:[%s5589_s1 + $0x130] ss:$36 sps:$4 sm:$0xff]   ;;  %v5673_v48 = vld [vmem:[#allocation19_spill] sm:$0xff] }
 0x36a   :  { %v4246_v5 = vld [vmem:[%s5589_s1 + $0x20] ss:$36 sps:$4 sm:$0xff]  }
 0x36b   :  { %v2725_v54 = vadd.f32 %v3755_v15, %v2619_v56  ;;  %v4240_v15 = vld [vmem:[%s5589_s1 + $0x17c] ss:$36 sps:$4 sm:$0xff]   ;;  %v5685_v56 = vld [vmem:[#allocation7_spill] sm:$0xff] }
 0x36d   :  { %v3756_v4 = vpop.f32.mrb[100].mxu1 }
 0x36e   :  { %v3757_v35 = vpop.f32.mrb[101].mxu1 }
 0x36f   :  { %v3758_v44 = vadd.f32 %v3757_v35, %v3756_v4  ;;  %v3759_v25 = vpop.f32.mrb[102].mxu1  ;;  %v5674_v4 = vld [vmem:[#allocation20_spill] sm:$0xff]  ;;  %v4241_v35 = vld [vmem:[%s5589_s1 + $0x178] ss:$36 sps:$4 sm:$0xff]  }
 0x370   :  { %v3760_v46 = vpop.f32.mrb[103].mxu1 }
 0x371   :  { %v3761_v61 = vadd.f32 %v3760_v46, %v3759_v25  ;;  %v2730_v59 = vadd.f32 %v3758_v44, %v2624_v2  ;;  %v5675_v44 = vld [vmem:[#allocation21_spill] sm:$0xff]  ;;  %v4242_v25 = vld [vmem:[%s5589_s1 + $0x1c4] ss:$36 sps:$4 sm:$0xff]  }
 0x372   :  { %v5676_v46 = vld [vmem:[#allocation22_spill] sm:$0xff] }
 0x373   :  { %v2733_v34 = vadd.f32 %v3761_v61, %v2629_v37  ;;  %v4243_v61 = vld [vmem:[%s5589_s1 + $0x1c0] ss:$36 sps:$4 sm:$0xff]  }
 0x375   :  { %v3865_v49 = vpop.f32.mrb[104].mxu1 }
 0x376   :  { %v2819_v29 = vpop.f32.mrb[105].mxu1 }
 0x377   :  { %v3866_v50 = vpop.f32.mrb[106].mxu1 }
 0x378   :  { %v2822_v20 = vpop.f32.mrb[107].mxu1 }
 0x385   :  { %v3778_v60 = vpop.f32.mrb[88].mxu0 }
 0x386   :  { %v3779_v7 = vpop.f32.mrb[89].mxu0 }
 0x387   :  { %v3780_v0 = vadd.f32 %v3779_v7, %v3778_v60  ;;  %v3781_v52 = vpop.f32.mrb[90].mxu0  ;;  %v5679_v60 = vld [vmem:[#allocation25_spill] sm:$0xff]  ;;  %v5680_v7 = vld [vmem:[#allocation2_spill] sm:$0xff] }
 0x388   :  { %v3782_v40 = vpop.f32.mrb[91].mxu0 }
 0x389   :  { %v2771_v17 = vadd.f32 %v3780_v0, %v2722_v28  ;;  %v3783_v23 = vadd.f32 %v3782_v40, %v3781_v52  ;;  %v5681_v28 = vld [vmem:[#allocation3_spill] sm:$0xff]  ;;  %v5682_v0 = vld [vmem:[#allocation4_spill] sm:$0xff]  ;;  %v5683_v52 = vld [vmem:[#allocation5_spill] sm:$0xff] }
 0x38a   :  { %v5686_v40 = vld [vmem:[#allocation8_spill] sm:$0xff] }
 0x38b   :  { %v2820_v43 = vadd.f32 %v2819_v29, %v2771_v17  ;;  %v2774_v6 = vadd.f32 %v3783_v23, %v2725_v54  ;;  %v4244_v29 = vld [vmem:[%s5589_s1 + $0x20c] ss:$36 sps:$4 sm:$0xff]   ;;  %v4248_v54 = vmov 0.0   ;;  %v5570_v17 = vld [vmem:[%s5591_s4] sm:$0xff] }
 0x38c   :  { %v3479_v23 = vcombine.high %v5570_v17, %v5570_v17 }
 0x38d   :  { %v2823_v18 = vadd.f32 %v2822_v20, %v2774_v6  ;;  %v3784_v39 = vpop.f32.mrb[92].mxu0  ;;  %v2834_v22 = vmax.f32 %v2820_v43, 0.0  ;;  %v4245_v20 = vld [vmem:[%s5589_s1 + $0x208] ss:$36 sps:$4 sm:$0xff]  }
 0x38e   :  { %v3785_v42 = vpop.f32.mrb[93].mxu0 }
 0x38f   :  { %v2835_v13 = vmax.f32 %v2823_v18, 0.0  ;;  %v3786_v53 = vadd.f32 %v3785_v42, %v3784_v39  ;;  %v3787_v10 = vpop.f32.mrb[94].mxu0 }
 0x390   :  { %v3788_v62 = vpop.f32.mrb[95].mxu0 }
 0x391   :  { %v5469_v51 = vpack.c.bf16 %v2835_v13, %v2834_v22  ;;  %v2779_v58 = vadd.f32 %v3786_v53, %v2730_v59  ;;  %v3789_v1 = vadd.f32 %v3788_v62, %v3787_v10 }
 0x393   :  { %v2828_v45 = vadd.f32 %v3865_v49, %v2779_v58  ;;  %v2782_v63 = vadd.f32 %v3789_v1, %v2733_v34  ;;  %2875 = vmatmul.mubr.bf16.vlgmr.msra.gmra.mrb[96].mxu0 %v5469_v51  ;;  %2928 = vmatmul.mubr.bf16.vlgmr.msra.gmra.mrb[108].mxu1 %v5469_v51  ;;  %v5677_v49 = vld [vmem:[#allocation23_spill] sm:$0xff] }
 0x394   :  { %2949 = vmatpush1.bf16.msra.mxu0 %v4231_v47  ;;  %3002 = vmatpush1.bf16.msra.mxu1 %v5665_v8 }
 0x395   :  { %v2831_v12 = vadd.f32 %v3866_v50, %v2782_v63  ;;  %2950 = vmatprep.subr.bf16.mxu0 %v4232_v14  ;;  %3003 = vmatprep.subr.bf16.mxu1 %v5666_v16  ;;  %v2836_v19 = vmax.f32 %v2828_v45, 0.0  ;;  %v5678_v50 = vld [vmem:[#allocation24_spill] sm:$0xff] }
 0x396   :  { %2884 = vmatprep.mubr.bf16.mxu0 %v5659_v27  ;;  %2937 = vmatprep.mubr.bf16.mxu1 %v5659_v27 }
 0x397   :  { %v2837_v3 = vmax.f32 %v2831_v12, 0.0 }
 0x398   :  { %2951 = vmatpush1.bf16.msra.mxu0 %v4233_v26  ;;  %3004 = vmatpush1.bf16.msra.mxu1 %v5667_v9 }
 0x399   :  { %v5487_v11 = vpack.c.bf16 %v2837_v3, %v2836_v19  ;;  %2952 = vmatprep.subr.bf16.mxu0 %v4234_v33  ;;  %3005 = vmatprep.subr.bf16.mxu1 %v5668_v21 }
 0x39b   :  { %2885 = vmatmul.mubr.bf16.gmra.mrb[100].mxu0 %v5487_v11  ;;  %2938 = vmatmul.mubr.bf16.gmra.mrb[112].mxu1 %v5487_v11 }
 0x39c   :  { %2953 = vmatpush1.bf16.msra.mxu0 %v4235_v30  ;;  %3006 = vmatpush1.bf16.msra.mxu1 %v5669_v32 }
 0x39d   :  { %2954 = vmatprep.subr.bf16.mxu0 %v4236_v57  ;;  %3007 = vmatprep.subr.bf16.mxu1 %v5670_v55 }
 0x39e   :  { %2980 = vmatprep.mubr.bf16.mxu0 %v5659_v27  ;;  %3033 = vmatprep.mubr.bf16.mxu1 %v5659_v27 }
 0x3a0   :  { %2955 = vmatpush1.bf16.msra.mxu0 %v4237_v31  ;;  %3008 = vmatpush1.bf16.msra.mxu1 %v5671_v36 }
 0x3a1   :  { %2956 = vmatprep.subr.bf16.mxu0 %v4238_v38  ;;  %3009 = vmatprep.subr.bf16.mxu1 %v5672_v41 }
 0x3a4   :  { %2957 = vmatpush1.bf16.msra.mxu0 %v4239_v24  ;;  %3010 = vmatpush1.bf16.msra.mxu1 %v5673_v48 }
 0x3a5   :  { %2958 = vmatprep.subr.bf16.mxu0 %v4240_v15  ;;  %3011 = vmatprep.subr.bf16.mxu1 %v5674_v4 }
 0x3a8   :  { %2959 = vmatpush1.bf16.msra.mxu0 %v4241_v35  ;;  %3012 = vmatpush1.bf16.msra.mxu1 %v5675_v44 }
 0x3a9   :  { %2960 = vmatprep.subr.bf16.mxu0 %v4242_v25  ;;  %3013 = vmatprep.subr.bf16.mxu1 %v5676_v46 }
 0x3ac   :  { %2961 = vmatpush1.bf16.msra.mxu0 %v4243_v61  ;;  %3014 = vmatpush1.bf16.msra.mxu1 %v5677_v49 }
 0x3ad   :  { %2962 = vmatprep.subr.bf16.mxu0 %v4244_v29  ;;  %3015 = vmatprep.subr.bf16.mxu1 %v5678_v50 }
 0x3b0   :  { %2963 = vmatpush1.bf16.msra.mxu0 %v4245_v20  ;;  %3016 = vmatpush1.bf16.msra.mxu1 %v5679_v60 }
 0x3b1   :  { %3867 = vmatprep.subr.bf16.mxu0 %v4246_v5 }
 0x3b3   :  { %2981 = vmatmul.mubr.bf16.vlgmr.msra.gmra.mrb[104].mxu0 %v5469_v51  ;;  %3034 = vmatmul.mubr.bf16.vlgmr.msra.gmra.mrb[116].mxu1 %v5469_v51 }
 0x3b4   :  { %3868 = vmatpush3.bf16.msra.mxu0 %v4246_v5  ;;  %2990 = vmatprep.mubr.bf16.mxu0 %v5659_v27 }
 0x3b5   :  { %3869 = vmatprep.subr.bf16.mxu0 %v5680_v7  ;;  %3043 = vmatprep.mubr.bf16.mxu1 %v5659_v27  ;;  %v5684_v27 = vld [vmem:[#allocation6_spill] sm:$0xff] }
 0x3b8   :  { %3870 = vmatpush3.bf16.msra.mxu0 %v5680_v7  ;;  %v3478_v7 = vcombine.low %v5570_v17, %v5570_v17 }
 0x3b9   :  { %3871 = vmatprep.subr.bf16.mxu0 %v5681_v28 }
 0x3bb   :  { %2991 = vmatmul.mubr.bf16.gmra.mrb[108].mxu0 %v5487_v11  ;;  %3044 = vmatmul.mubr.bf16.gmra.mrb[120].mxu1 %v5487_v11 }
 0x3bc   :  { %3872 = vmatpush3.bf16.msra.mxu0 %v5681_v28  ;;  %3883 = vmatprep.mubr.bf16.mxu0 %v5469_v51  ;;  %v4212_v28 = vld [vmem:[%s5591_s4 + $0x8] ss:$0 sps:$4 sm:$0xff]  }
 0x3bd   :  { %3873 = vmatprep.subr.bf16.mxu0 %v5682_v0  ;;  %3173 = vmatprep.mubr.bf16.mxu1 %v3479_v23 }
 0x3c0   :  { %3874 = vmatpush3.bf16.msra.mxu0 %v5682_v0 }
 0x3c1   :  { %3875 = vmatprep.subr.bf16.mxu0 %v5683_v52 }
 0x3c4   :  { %3876 = vmatpush3.bf16.msra.mxu0 %v5683_v52 }
 0x3c5   :  { %3877 = vmatprep.subr.bf16.mxu0 %v5684_v27 }
 0x3c8   :  { %3878 = vmatpush3.bf16.msra.mxu0 %v5684_v27 }
 0x3c9   :  { %3879 = vmatprep.subr.bf16.mxu0 %v5685_v56 }
 0x3cc   :  { %3880 = vmatpush3.bf16.msra.mxu0 %v5685_v56 }
 0x3cd   :  { %3881 = vmatprep.subr.bf16.mxu0 %v5686_v40 }
 0x3d0   :  { %3882 = vmatpush3.bf16.msra.mxu0 %v5686_v40  ;;  %v3125_v40 = vpop.permute.xlu0 %3124 }
 0x3d1   :  { %3887 = vmatprep.subr.bf16.mxu0 %v4248_v54 }
 0x3d3   :  { %3884 = vmatmul.mubr.bf16.vlgmr.msra.gmra.mrb[112].mxu0 %v5487_v11 }
 0x3d4   :  { %3891 = vmatprep.mubr.msk.bf16.mxu0 %vm4249_vm1, %v4248_v54 }
 0x466   :  { %v2876_v43 = vpop.f32.mrb[96].mxu0  ;;  %v2929_v6 = vpop.f32.mrb[108].mxu1 }
 0x467   :  { %v2878_v18 = vpop.f32.mrb[97].mxu0  ;;  %v2931_v39 = vpop.f32.mrb[109].mxu1 }
 0x468   :  { %v2880_v2 = vpop.f32.mrb[98].mxu0  ;;  %v2933_v42 = vpop.f32.mrb[110].mxu1 }
 0x469   :  { %v3103_v59 = vpack.c.bf16 %v2880_v2, %v2876_v43  ;;  %v3105_v22 = vpack.c.bf16 %v2933_v42, %v2929_v6  ;;  %v2882_v13 = vpop.f32.mrb[99].mxu0  ;;  %v2935_v53 = vpop.f32.mrb[111].mxu1 }
 0x46a   :  { %v3104_v10 = vpack.c.bf16 %v2882_v13, %v2878_v18  ;;  %v3106_v37 = vpack.c.bf16 %v2935_v53, %v2931_v39 }
 0x46e   :  { %v2886_v62 = vpop.f32.mrb[100].mxu0  ;;  %v2939_v34 = vpop.f32.mrb[112].mxu1 }
 0x46f   :  { %v2888_v51 = vpop.f32.mrb[101].mxu0  ;;  %v2941_v58 = vpop.f32.mrb[113].mxu1 }
 0x470   :  { %v2890_v1 = vpop.f32.mrb[102].mxu0  ;;  %v2943_v45 = vpop.f32.mrb[114].mxu1 }
 0x471   :  { %v3112_v63 = vpack.c.bf16 %v2890_v1, %v2886_v62  ;;  %v3114_v47 = vpack.c.bf16 %v2943_v45, %v2939_v34  ;;  %v2892_v8 = vpop.f32.mrb[103].mxu0  ;;  %v2945_v12 = vpop.f32.mrb[115].mxu1 }
 0x472   :  { %v3113_v14 = vpack.c.bf16 %v2892_v8, %v2888_v51  ;;  %v3115_v16 = vpack.c.bf16 %v2945_v12, %v2941_v58 }
 0x486   :  { %v2982_v19 = vpop.f32.mrb[104].mxu0  ;;  %v3035_v3 = vpop.f32.mrb[116].mxu1 }
 0x487   :  { %v2984_v26 = vpop.f32.mrb[105].mxu0  ;;  %v3037_v9 = vpop.f32.mrb[117].mxu1 }
 0x488   :  { %v2986_v11 = vpop.f32.mrb[106].mxu0  ;;  %v3039_v33 = vpop.f32.mrb[118].mxu1 }
 0x489   :  { %v3107_v21 = vpack.c.bf16 %v2986_v11, %v2982_v19  ;;  %v3109_v30 = vpack.c.bf16 %v3039_v33, %v3035_v3  ;;  %v2988_v32 = vpop.f32.mrb[107].mxu0  ;;  %v3041_v57 = vpop.f32.mrb[119].mxu1 }
 0x48a   :  { %v3108_v55 = vpack.c.bf16 %v2988_v32, %v2984_v26  ;;  %v3110_v31 = vpack.c.bf16 %v3041_v57, %v3037_v9 }
 0x48b   :  { %3806 = vmatprep.subr.bf16.mxu1 %v3107_v21 }
 0x48c   :  { %3807 = vmatpush3.bf16.msra.mxu1 %v3103_v59 }
 0x48e   :  { %v2992_v36 = vpop.f32.mrb[108].mxu0  ;;  %v3045_v38 = vpop.f32.mrb[120].mxu1 }
 0x48f   :  { %v2994_v41 = vpop.f32.mrb[109].mxu0  ;;  %v3047_v24 = vpop.f32.mrb[121].mxu1 }
 0x490   :  { %v2996_v48 = vpop.f32.mrb[110].mxu0  ;;  %v3049_v15 = vpop.f32.mrb[122].mxu1 }
 0x491   :  { %v3116_v4 = vpack.c.bf16 %v2996_v48, %v2992_v36  ;;  %v3118_v35 = vpack.c.bf16 %v3049_v15, %v3045_v38  ;;  %v2998_v44 = vpop.f32.mrb[111].mxu0  ;;  %v3051_v25 = vpop.f32.mrb[123].mxu1 }
 0x492   :  { %v3117_v46 = vpack.c.bf16 %v2998_v44, %v2994_v41  ;;  %v3119_v61 = vpack.c.bf16 %v3051_v25, %v3047_v24 }
 0x493   :  { %3808 = vmatprep.subr.bf16.mxu1 %v3116_v4 }
 0x494   :  { %3809 = vmatpush3.bf16.msra.mxu1 %v3112_v63 }
 0x495   :  { %3810 = vmatprep.subr.bf16.mxu1 %v3108_v55 }
 0x498   :  { %3811 = vmatpush3.bf16.msra.mxu1 %v3104_v10 }
 0x499   :  { %3812 = vmatprep.subr.bf16.mxu1 %v3117_v46 }
 0x49c   :  { %3813 = vmatpush3.bf16.msra.mxu1 %v3113_v14 }
 0x49d   :  { %3814 = vmatprep.subr.bf16.mxu1 %v3109_v30 }
 0x4a0   :  { %3815 = vmatpush3.bf16.msra.mxu1 %v3105_v22 }
 0x4a1   :  { %3816 = vmatprep.subr.bf16.mxu1 %v3118_v35 }
 0x4a4   :  { %3817 = vmatpush3.bf16.msra.mxu1 %v3114_v47 }
 0x4a5   :  { %3818 = vmatprep.subr.bf16.mxu1 %v3110_v31 }
 0x4a6   :  { %v3885_v49 = vpop.f32.mrb[112].mxu0 }
 0x4a7   :  { %v3088_v29 = vpop.f32.mrb[113].mxu0 }
 0x4a8   :  { %v3886_v50 = vpop.f32.mrb[114].mxu0  ;;  %3819 = vmatpush3.bf16.msra.mxu1 %v3106_v37 }
 0x4a9   :  { %v3120_v20 = vpack.c.bf16 %v3886_v50, %v3885_v49  ;;  %v3091_v60 = vpop.f32.mrb[115].mxu0  ;;  %3820 = vmatprep.subr.bf16.mxu1 %v3119_v61 }
 0x4aa   :  { %v3111_v5 = vpack.c.bf16 %v3091_v60, %v3088_v29 }
 0x4ac   :  { %3821 = vmatpush3.bf16.msra.mxu1 %v3115_v16  ;;  %3888 = vmatpush3.bf16.msra.mxu0 %v3111_v5 }
 0x4ad   :  { %3889 = vmatprep.subr.bf16.mxu0 %v4248_v54 }
 0x4af   :  { %3174 = vmatmul.mubr.bf16.vlgmr.msra.gmra.mrb[124].mxu1 %v3478_v7 }
 0x4b0   :  { %3890 = vmatpush3.bf16.msra.mxu0 %v3120_v20 }
 0x4b3   :  { %3892 = vmatmul.mubr.msk.bf16.vlgmr.msra.gmra.mrb[116].mxu0 %vm3137_vm2, %v4212_v28 }
 0x582   :  { %v3822_v0 = vpop.f32.mrb[124].mxu1 }
 0x583   :  { %v3823_v52 = vpop.f32.mrb[125].mxu1 }
 0x584   :  { %v3824_v27 = vadd.f32 %v3823_v52, %v3822_v0  ;;  %v3825_v56 = vpop.f32.mrb[126].mxu1 }
 0x585   :  { %v3826_v23 = vpop.f32.mrb[127].mxu1 }
 0x586   :  { %v3176_v43 = vadd.f32 %v3824_v27, %v3125_v40  ;;  %v3215_v17 = vpop.f32.mrb[116].mxu0 }
 0x587   :  { %v3893_v6 = vpop.f32.mrb[117].mxu0 }
 0x588   :  { %v3216_v18 = vadd.f32 %v3215_v17, %v3176_v43  ;;  %v3218_v39 = vpop.f32.mrb[118].mxu0 }
 0x589   :  { %v3894_v54 = vpop.f32.mrb[119].mxu0 }
 0x58a   :  { %3221 = vst [vmem:[%s5592_s8] sm:$0xff] %v3216_v18 }

</bundles_post_ra>
